<compile_context>
chip_gen: v6e
topology: v6e:2x2x1
jax: 0.10.0
libtpu: 0.0.40
codegen_flags: <defaults>
</compile_context>

<pallas_src>
import functools
import math

import jax
import jax.numpy as jnp
from jax.experimental import pallas as pl
from jax.experimental.pallas import tpu as pltpu


def encoder_layer_kernel(x_ref, mask_ref,
                         wq_ref, wk_ref, wv_ref,            # bf16 [H, D, hd]
                         wc_ref, bc_ref,                     # bf16 [H, hd, D], f32 [1, D]
                         w1_ref, b1_ref,                     # bf16 [D, 4D],   f32 [1, 4D]
                         w2_ref, b2_ref,                     # bf16 [4D, D],   f32 [1, D]
                         g1_ref, be1_ref, g2_ref, be2_ref,   # f32 [1, D]
                         o_ref, *, n_heads, n_nodes, eps):
    x = x_ref[...].astype(jnp.float32)                       # [R, D], R = bpb * N
    R, D = x.shape
    N = n_nodes
    bpb = R // N
    hd = D // n_heads
    scale = 1.0 / math.sqrt(hd)

    x_bf = x.astype(jnp.bfloat16)
    mask = mask_ref[...].astype(jnp.float32)                 # [bpb, N, N] additive mask

    # ---- multi-head self-attention (no lane slicing, no concat) -----------------
    acc = jnp.zeros((R, D), jnp.float32)
    for h in range(n_heads):
        qh = jnp.dot(x_bf, wq_ref[h], preferred_element_type=jnp.float32)   # [R, hd]
        kh = jnp.dot(x_bf, wk_ref[h], preferred_element_type=jnp.float32)
        vh = jnp.dot(x_bf, wv_ref[h], preferred_element_type=jnp.float32)

        qb = qh.reshape(bpb, N, hd).astype(jnp.bfloat16)
        kb = kh.reshape(bpb, N, hd).astype(jnp.bfloat16)
        vb = vh.reshape(bpb, N, hd).astype(jnp.bfloat16)

        s = jnp.einsum("bnk,bmk->bnm", qb, kb,
                       preferred_element_type=jnp.float32) * scale          # [bpb, N, N]
        s = s + mask                                  # mask added after scaling
        s = s - jnp.max(s, axis=-1, keepdims=True)
        p = jnp.exp(s)
        p = p * pl.reciprocal(jnp.sum(p, axis=-1, keepdims=True), approx=True)

        oh = jnp.einsum("bnm,bmk->bnk", p.astype(jnp.bfloat16), vb,
                        preferred_element_type=jnp.float32)                 # [bpb, N, hd]
        # fold head-concat into the combine matmul: accumulate (p @ v_h) @ Wc[h]
        acc = acc + jnp.dot(oh.reshape(R, hd).astype(jnp.bfloat16), wc_ref[h],
                            preferred_element_type=jnp.float32)             # [R, D]

    x1 = x + acc + bc_ref[...]                        # combine bias + residual

    # ---- LayerNorm 1 (f32) -------------------------------------------------------
    mu1 = jnp.mean(x1, axis=-1, keepdims=True)
    var1 = jnp.mean((x1 - mu1) ** 2, axis=-1, keepdims=True)
    xn1 = (x1 - mu1) * jax.lax.rsqrt(var1 + eps) * g1_ref[...] + be1_ref[...]

    # ---- Feed-forward (D -> 4D -> D) + residual ----------------------------------
    h1 = jnp.dot(xn1.astype(jnp.bfloat16), w1_ref[...],
                 preferred_element_type=jnp.float32) + b1_ref[...]
    h1 = jnp.maximum(h1, 0.0)
    ff = jnp.dot(h1.astype(jnp.bfloat16), w2_ref[...],
                 preferred_element_type=jnp.float32) + b2_ref[...]
    x2 = xn1 + ff

    # ---- LayerNorm 2 (f32) -------------------------------------------------------
    mu2 = jnp.mean(x2, axis=-1, keepdims=True)
    var2 = jnp.mean((x2 - mu2) ** 2, axis=-1, keepdims=True)
    out = (x2 - mu2) * jax.lax.rsqrt(var2 + eps) * g2_ref[...] + be2_ref[...]

    o_ref[...] = out.astype(o_ref.dtype)


def _choose_batches_per_block(B, N, target_rows=256):
    """How many whole batches each grid step processes (M = bpb*N rows per step)."""
    max_bpb = max(1, target_rows // max(N, 1))
    if B >= 2:
        max_bpb = min(max_bpb, B // 2)      # keep >= 2 parallel grid steps (v7x: 2 TCs)
    max_bpb = max(1, min(max_bpb, B))
    bpb = 1
    for d in range(1, max_bpb + 1):         # largest divisor of B that fits
        if B % d == 0:
            bpb = d
    # keep the row block sublane-aligned unless the block already covers everything
    if bpb != B and (bpb * N) % 8 != 0:
        bpb = B
    return bpb


def _vmem_bytes_estimate(R, N, D, H, bpb):
    """Rough upper bound on the kernel's VMEM footprint (bytes)."""
    hd = D // H
    pad = lambda n, m: ((n + m - 1) // m) * m
    # bf16 weights (per-head slabs are lane/sublane padded); x2 for pipeline buffering
    w = 2 * 2 * (3 * H * pad(D, 8) * pad(hd, 128)
                 + H * pad(hd, 8) * pad(D, 128)
                 + pad(D, 8) * pad(4 * D, 128)
                 + pad(4 * D, 8) * pad(D, 128))
    # f32 bias / LayerNorm params
    p = 2 * 4 * (6 * pad(1, 8) * pad(D, 128) + pad(1, 8) * pad(4 * D, 128))
    # f32 x / out / mask pipeline blocks (double buffered)
    io = 2 * 4 * (2 * pad(R, 8) * pad(D, 128) + bpb * pad(N, 8) * pad(N, 128))
    # live f32 activations inside the body (rough upper bound)
    act = 4 * (8 * pad(R, 8) * pad(D, 128)
               + 2 * pad(R, 8) * pad(4 * D, 128)
               + 4 * bpb * pad(N, 8) * pad(N, 128)
               + 6 * pad(R, 8) * pad(hd, 128))
    return w + p + io + act


def encoder_layer(x, mask, params, n_heads=8, eps=1e-5):
    """x: [B, N, D] float32; mask: [B, N, N] additive float32."""
    B, N, D = x.shape
    (wq, wk, wv, wc, bc, w1, b1, w2, b2, g1, be1, g2, be2) = params
    hd = D // n_heads
    assert hd * n_heads == D

    # Pre-split weights per head (no in-kernel lane slicing / concat) and store the
    # matmul weights in bf16 (MXU-native; halves weight DMA bytes).
    wq3 = wq.reshape(D, n_heads, hd).transpose(1, 0, 2).astype(jnp.bfloat16)  # [H, D, hd]
    wk3 = wk.reshape(D, n_heads, hd).transpose(1, 0, 2).astype(jnp.bfloat16)
    wv3 = wv.reshape(D, n_heads, hd).transpose(1, 0, 2).astype(jnp.bfloat16)
    wc3 = wc.reshape(n_heads, hd, D).astype(jnp.bfloat16)                     # [H, hd, D]
    w1b = w1.astype(jnp.bfloat16)
    w2b = w2.astype(jnp.bfloat16)

    bpb = _choose_batches_per_block(B, N)
    R = bpb * N
    grid = (B // bpb,)

    x_flat = x.reshape(B * N, D)   # lane-dense 2-D row slab for projections / FFN / output

    def full_spec(shape):
        return pl.BlockSpec(shape, lambda i: (0,) * len(shape))

    in_specs = [
        pl.BlockSpec((R, D), lambda i: (i, 0)),           # x rows (bpb whole batches)
        pl.BlockSpec((bpb, N, N), lambda i: (i, 0, 0)),   # additive attention mask
        full_spec((n_heads, D, hd)),                      # Wq
        full_spec((n_heads, D, hd)),                      # Wk
        full_spec((n_heads, D, hd)),                      # Wv
        full_spec((n_heads, hd, D)), full_spec((1, D)),   # combine W, b
        full_spec((D, 4 * D)), full_spec((1, 4 * D)),     # FF W1, b1
        full_spec((4 * D, D)), full_spec((1, D)),         # FF W2, b2
        full_spec((1, D)), full_spec((1, D)),             # ln1 gamma, beta
        full_spec((1, D)), full_spec((1, D)),             # ln2 gamma, beta
    ]
    out_specs = pl.BlockSpec((R, D), lambda i: (i, 0))

    vmem_limit = int(min(64 * 1024 * 1024,
                         max(24 * 1024 * 1024,
                             2 * _vmem_bytes_estimate(R, N, D, n_heads, bpb))))

    flops = (2 * B * N * D * D * 3            # QKV projections
             + 2 * B * n_heads * N * N * hd * 2   # scores + p @ v
             + 2 * B * N * D * D              # head combine
             + 2 * B * N * D * 4 * D * 2)     # FFN
    transcendentals = B * n_heads * N * N + 2 * B * N
    bytes_accessed = ((B * N * D * 2 + B * N * N) * 4        # x in, out, mask (f32)
                      + (3 * D * D + D * D + 8 * D * D) * 2  # bf16 weights
                      + (6 * D + 4 * D) * 4)                 # f32 biases / LN params
    cost = pl.CostEstimate(flops=flops, transcendentals=transcendentals,
                           bytes_accessed=bytes_accessed)

    out_flat = pl.pallas_call(
        functools.partial(encoder_layer_kernel, n_heads=n_heads, n_nodes=N, eps=eps),
        out_shape=jax.ShapeDtypeStruct((B * N, D), x.dtype),
        grid=grid,
        in_specs=in_specs,
        out_specs=out_specs,
        compiler_params=pltpu.CompilerParams(
            dimension_semantics=("parallel",),
            vmem_limit_bytes=vmem_limit),
        cost_estimate=cost,
    )(x_flat, mask, wq3, wk3, wv3, wc3, bc, w1b, b1, w2b, b2, g1, be1, g2, be2)

    return out_flat.reshape(B, N, D)


def encoder_layer_ref(x, mask, params, n_heads=8, eps=1e-5):
    """Pure-JAX f32 reference mirroring the PyTorch forward exactly."""
    (wq, wk, wv, wc, bc, w1, b1, w2, b2, g1, be1, g2, be2) = params
    B, N, D = x.shape
    hd = D // n_heads

    def make_heads(t):  # [B, N, D] -> [B, H, N, hd]
        return t.reshape(B, N, n_heads, hd).transpose(0, 2, 1, 3)

    q = make_heads(x @ wq)
    k = make_heads(x @ wk)
    v = make_heads(x @ wv)
    score = jnp.einsum("bhnd,bhmd->bhnm", q, k) / jnp.sqrt(jnp.float32(hd))
    score = score + mask[:, None, :, :]
    p = jax.nn.softmax(score, axis=-1)
    attn = jnp.einsum("bhnm,bhmd->bhnd", p, v).transpose(0, 2, 1, 3).reshape(B, N, D)

    def layernorm(t, g, b):
        mu = jnp.mean(t, axis=-1, keepdims=True)
        var = jnp.mean((t - mu) ** 2, axis=-1, keepdims=True)
        return (t - mu) * jax.lax.rsqrt(var + eps) * g[0] + b[0]

    x1 = x + attn @ wc + bc[0]
    xn1 = layernorm(x1, g1, be1)
    ff = jnp.maximum(xn1 @ w1 + b1[0], 0.0) @ w2 + b2[0]
    x2 = xn1 + ff
    return layernorm(x2, g2, be2)


def init_params(key, D):
    ks = jax.random.split(key, 9)
    # Linear weights stored as [in, out] (already "transposed" relative to torch).
    wq = jax.random.normal(ks[0], (D, D), jnp.float32) / math.sqrt(D)
    wk = jax.random.normal(ks[1], (D, D), jnp.float32) / math.sqrt(D)
    wv = jax.random.normal(ks[2], (D, D), jnp.float32) / math.sqrt(D)
    wc = jax.random.normal(ks[3], (D, D), jnp.float32) / math.sqrt(D)
    bc = jax.random.normal(ks[4], (1, D), jnp.float32) * 0.01
    # feed_forward[0]: kaiming_normal fan_out, relu -> std = sqrt(2 / 4D)
    w1 = jax.random.normal(ks[5], (D, 4 * D), jnp.float32) * math.sqrt(2.0 / (4 * D))
    b1 = jnp.zeros((1, 4 * D), jnp.float32)
    # feed_forward[2]: kaiming_normal fan_in, relu -> std = sqrt(2 / 4D)
    w2 = jax.random.normal(ks[6], (4 * D, D), jnp.float32) * math.sqrt(2.0 / (4 * D))
    b2 = jnp.zeros((1, D), jnp.float32)
    # LayerNorms: default torch init (gamma=1, beta=0)
    g1 = jnp.ones((1, D), jnp.float32)
    be1 = jnp.zeros((1, D), jnp.float32)
    g2 = jnp.ones((1, D), jnp.float32)
    be2 = jnp.zeros((1, D), jnp.float32)
    return (wq, wk, wv, wc, bc, w1, b1, w2, b2, g1, be1, g2, be2)


if __name__ == "__main__":
    B, N, D, H = 2, 8, 32, 8
    key = jax.random.PRNGKey(0)
    kx, km, kp = jax.random.split(key, 3)

    x = jax.random.normal(kx, (B, N, D), jnp.float32)
    # Additive attention mask (mask=None in the module corresponds to zeros here).
    mask = jnp.zeros((B, N, N), jnp.float32)
    params = init_params(kp, D)

    out = encoder_layer(x, mask, params, n_heads=H)
    out = jax.block_until_ready(out)

    ref = encoder_layer_ref(x, mask, params, n_heads=H)
    assert out.shape == (B, N, D)
    # Tolerance loosened vs. the f32 version: matmuls now run in bf16 (f32 accum) and
    # the softmax uses the approximate EUP reciprocal.
    max_err = float(jnp.max(jnp.abs(out - ref)))
    assert jnp.allclose(out, ref, atol=5e-2, rtol=5e-2), f"max abs err {max_err}"

    print("KERNEL_OK")
</pallas_src>

<mosaic_0001>
module attributes {stable_mosaic.version = 11 : i64} {
  func.func @encoder_layer_kernel(%arg0: i32, %arg1: memref<8x32xf32, #tpu.memory_space<vmem>>, %arg2: memref<1x8x8xf32, #tpu.memory_space<vmem>>, %arg3: memref<8x32x4xbf16, #tpu.memory_space<vmem>>, %arg4: memref<8x32x4xbf16, #tpu.memory_space<vmem>>, %arg5: memref<8x32x4xbf16, #tpu.memory_space<vmem>>, %arg6: memref<8x4x32xbf16, #tpu.memory_space<vmem>>, %arg7: memref<1x32xf32, #tpu.memory_space<vmem>>, %arg8: memref<32x128xbf16, #tpu.memory_space<vmem>>, %arg9: memref<1x128xf32, #tpu.memory_space<vmem>>, %arg10: memref<128x32xbf16, #tpu.memory_space<vmem>>, %arg11: memref<1x32xf32, #tpu.memory_space<vmem>>, %arg12: memref<1x32xf32, #tpu.memory_space<vmem>>, %arg13: memref<1x32xf32, #tpu.memory_space<vmem>>, %arg14: memref<1x32xf32, #tpu.memory_space<vmem>>, %arg15: memref<1x32xf32, #tpu.memory_space<vmem>>, %arg16: memref<8x32xf32, #tpu.memory_space<vmem>>) attributes {dimension_semantics = [#tpu.dimension_semantics<parallel>], iteration_bounds = array<i64: 2>, scalar_prefetch = 0 : i64, scratch_operands = 0 : i64, tpu.core_type = #tpu.core_type<tc>, window_params = [{transform_indices = @transform_0, window_bounds = array<i64: 8, 32>}, {transform_indices = @transform_1, window_bounds = array<i64: 1, 8, 8>}, {pipeline_mode = #tpu.pipeline_mode<synchronous>, transform_indices = @transform_2, window_bounds = array<i64: 8, 32, 4>}, {pipeline_mode = #tpu.pipeline_mode<synchronous>, transform_indices = @transform_3, window_bounds = array<i64: 8, 32, 4>}, {pipeline_mode = #tpu.pipeline_mode<synchronous>, transform_indices = @transform_4, window_bounds = array<i64: 8, 32, 4>}, {pipeline_mode = #tpu.pipeline_mode<synchronous>, transform_indices = @transform_5, window_bounds = array<i64: 8, 4, 32>}, {pipeline_mode = #tpu.pipeline_mode<synchronous>, transform_indices = @transform_6, window_bounds = array<i64: 1, 32>}, {pipeline_mode = #tpu.pipeline_mode<synchronous>, transform_indices = @transform_7, window_bounds = array<i64: 32, 128>}, {pipeline_mode = #tpu.pipeline_mode<synchronous>, transform_indices = @transform_8, window_bounds = array<i64: 1, 128>}, {pipeline_mode = #tpu.pipeline_mode<synchronous>, transform_indices = @transform_9, window_bounds = array<i64: 128, 32>}, {pipeline_mode = #tpu.pipeline_mode<synchronous>, transform_indices = @transform_10, window_bounds = array<i64: 1, 32>}, {pipeline_mode = #tpu.pipeline_mode<synchronous>, transform_indices = @transform_11, window_bounds = array<i64: 1, 32>}, {pipeline_mode = #tpu.pipeline_mode<synchronous>, transform_indices = @transform_12, window_bounds = array<i64: 1, 32>}, {pipeline_mode = #tpu.pipeline_mode<synchronous>, transform_indices = @transform_13, window_bounds = array<i64: 1, 32>}, {pipeline_mode = #tpu.pipeline_mode<synchronous>, transform_indices = @transform_14, window_bounds = array<i64: 1, 32>}, {transform_indices = @transform_15, window_bounds = array<i64: 8, 32>}]} {
    %c0 = arith.constant 0 : index
    %c0_0 = arith.constant 0 : index
    %0 = vector.load %arg1[%c0, %c0_0] : memref<8x32xf32, #tpu.memory_space<vmem>>, vector<8x32xf32>
    %1 = arith.truncf %0 : vector<8x32xf32> to vector<8x32xbf16>
    %c0_1 = arith.constant 0 : index
    %c0_2 = arith.constant 0 : index
    %c0_3 = arith.constant 0 : index
    %2 = vector.load %arg2[%c0_1, %c0_2, %c0_3] : memref<1x8x8xf32, #tpu.memory_space<vmem>>, vector<1x8x8xf32>
    %cst = arith.constant 0.000000e+00 : f32
    %3 = vector.broadcast %cst : f32 to vector<8x32xf32>
    %c0_4 = arith.constant 0 : index
    %c0_5 = arith.constant 0 : index
    %c0_6 = arith.constant 0 : index
    %4 = vector.load %arg3[%c0_4, %c0_5, %c0_6] : memref<8x32x4xbf16, #tpu.memory_space<vmem>>, vector<1x32x4xbf16>
    %5 = vector.shape_cast %4 : vector<1x32x4xbf16> to vector<32x4xbf16>
    %cst_7 = arith.constant dense<0.000000e+00> : vector<8x4xf32>
    %6 = tpu.matmul %1, %5, %cst_7 {dimension_numbers = #tpu.dot_dimension_numbers<[1], [0], [0], [1], [0, 0, 1, 1], [], []>} : vector<8x32xbf16>, vector<32x4xbf16>, vector<8x4xf32> -> vector<8x4xf32>
    %c0_8 = arith.constant 0 : index
    %c0_9 = arith.constant 0 : index
    %c0_10 = arith.constant 0 : index
    %7 = vector.load %arg4[%c0_8, %c0_9, %c0_10] : memref<8x32x4xbf16, #tpu.memory_space<vmem>>, vector<1x32x4xbf16>
    %8 = vector.shape_cast %7 : vector<1x32x4xbf16> to vector<32x4xbf16>
    %cst_11 = arith.constant dense<0.000000e+00> : vector<8x4xf32>
    %9 = tpu.matmul %1, %8, %cst_11 {dimension_numbers = #tpu.dot_dimension_numbers<[1], [0], [0], [1], [0, 0, 1, 1], [], []>} : vector<8x32xbf16>, vector<32x4xbf16>, vector<8x4xf32> -> vector<8x4xf32>
    %c0_12 = arith.constant 0 : index
    %c0_13 = arith.constant 0 : index
    %c0_14 = arith.constant 0 : index
    %10 = vector.load %arg5[%c0_12, %c0_13, %c0_14] : memref<8x32x4xbf16, #tpu.memory_space<vmem>>, vector<1x32x4xbf16>
    %11 = vector.shape_cast %10 : vector<1x32x4xbf16> to vector<32x4xbf16>
    %cst_15 = arith.constant dense<0.000000e+00> : vector<8x4xf32>
    %12 = tpu.matmul %1, %11, %cst_15 {dimension_numbers = #tpu.dot_dimension_numbers<[1], [0], [0], [1], [0, 0, 1, 1], [], []>} : vector<8x32xbf16>, vector<32x4xbf16>, vector<8x4xf32> -> vector<8x4xf32>
    %13 = vector.shape_cast %6 : vector<8x4xf32> to vector<1x8x4xf32>
    %14 = arith.truncf %13 : vector<1x8x4xf32> to vector<1x8x4xbf16>
    %15 = vector.shape_cast %9 : vector<8x4xf32> to vector<1x8x4xf32>
    %16 = arith.truncf %15 : vector<1x8x4xf32> to vector<1x8x4xbf16>
    %17 = vector.shape_cast %12 : vector<8x4xf32> to vector<1x8x4xf32>
    %18 = arith.truncf %17 : vector<1x8x4xf32> to vector<1x8x4xbf16>
    "tpu.trace_start"() <{level = 10 : i32, message = "bnk,bmk->bnm"}> : () -> ()
    %cst_16 = arith.constant dense<0.000000e+00> : vector<1x8x8xf32>
    %19 = tpu.matmul %14, %16, %cst_16 {dimension_numbers = #tpu.dot_dimension_numbers<[2], [2], [1], [1], [0, 0, 0, 1, 1, 1], [0], [0]>} : vector<1x8x4xbf16>, vector<1x8x4xbf16>, vector<1x8x8xf32> -> vector<1x8x8xf32>
    "tpu.trace_stop"() : () -> ()
    %cst_17 = arith.constant 5.000000e-01 : f32
    %20 = vector.broadcast %cst_17 : f32 to vector<1x8x8xf32>
    %21 = arith.mulf %19, %20 : vector<1x8x8xf32>
    %22 = arith.addf %21, %2 : vector<1x8x8xf32>
    %cst_18 = arith.constant dense<0xFF800000> : vector<1x8xf32>
    %23 = vector.multi_reduction <maximumf>, %22, %cst_18 [2] : vector<1x8x8xf32> to vector<1x8xf32>
    %24 = vector.shape_cast %23 : vector<1x8xf32> to vector<1x8x1xf32>
    %25 = vector.broadcast %24 : vector<1x8x1xf32> to vector<1x8x8xf32>
    %26 = arith.subf %22, %25 : vector<1x8x8xf32>
    %27 = math.exp %26 : vector<1x8x8xf32>
    %cst_19 = arith.constant dense<0.000000e+00> : vector<1x8xf32>
    %28 = vector.multi_reduction <add>, %27, %cst_19 [2] : vector<1x8x8xf32> to vector<1x8xf32>
    %29 = vector.shape_cast %28 : vector<1x8xf32> to vector<1x8x1xf32>
    %30 = tpu.reciprocal %29 {approx = true} : vector<1x8x1xf32> -> vector<1x8x1xf32>
    %31 = vector.broadcast %30 : vector<1x8x1xf32> to vector<1x8x8xf32>
    %32 = arith.mulf %27, %31 : vector<1x8x8xf32>
    %33 = arith.truncf %32 : vector<1x8x8xf32> to vector<1x8x8xbf16>
    "tpu.trace_start"() <{level = 10 : i32, message = "bnm,bmk->bnk"}> : () -> ()
    %cst_20 = arith.constant dense<0.000000e+00> : vector<1x8x4xf32>
    %34 = tpu.matmul %33, %18, %cst_20 {dimension_numbers = #tpu.dot_dimension_numbers<[2], [1], [1], [2], [0, 0, 0, 1, 1, 2], [0], [0]>} : vector<1x8x8xbf16>, vector<1x8x4xbf16>, vector<1x8x4xf32> -> vector<1x8x4xf32>
    "tpu.trace_stop"() : () -> ()
    %35 = vector.shape_cast %34 : vector<1x8x4xf32> to vector<8x4xf32>
    %36 = arith.truncf %35 : vector<8x4xf32> to vector<8x4xbf16>
    %c0_21 = arith.constant 0 : index
    %c0_22 = arith.constant 0 : index
    %c0_23 = arith.constant 0 : index
    %37 = vector.load %arg6[%c0_21, %c0_22, %c0_23] : memref<8x4x32xbf16, #tpu.memory_space<vmem>>, vector<1x4x32xbf16>
    %38 = vector.shape_cast %37 : vector<1x4x32xbf16> to vector<4x32xbf16>
    %cst_24 = arith.constant dense<0.000000e+00> : vector<8x32xf32>
    %39 = tpu.matmul %36, %38, %cst_24 {dimension_numbers = #tpu.dot_dimension_numbers<[1], [0], [0], [1], [0, 0, 1, 1], [], []>} : vector<8x4xbf16>, vector<4x32xbf16>, vector<8x32xf32> -> vector<8x32xf32>
    %40 = arith.addf %3, %39 : vector<8x32xf32>
    %c1 = arith.constant 1 : index
    %c0_25 = arith.constant 0 : index
    %c0_26 = arith.constant 0 : index
    %41 = vector.load %arg3[%c1, %c0_25, %c0_26] : memref<8x32x4xbf16, #tpu.memory_space<vmem>>, vector<1x32x4xbf16>
    %42 = vector.shape_cast %41 : vector<1x32x4xbf16> to vector<32x4xbf16>
    %cst_27 = arith.constant dense<0.000000e+00> : vector<8x4xf32>
    %43 = tpu.matmul %1, %42, %cst_27 {dimension_numbers = #tpu.dot_dimension_numbers<[1], [0], [0], [1], [0, 0, 1, 1], [], []>} : vector<8x32xbf16>, vector<32x4xbf16>, vector<8x4xf32> -> vector<8x4xf32>
    %c1_28 = arith.constant 1 : index
    %c0_29 = arith.constant 0 : index
    %c0_30 = arith.constant 0 : index
    %44 = vector.load %arg4[%c1_28, %c0_29, %c0_30] : memref<8x32x4xbf16, #tpu.memory_space<vmem>>, vector<1x32x4xbf16>
    %45 = vector.shape_cast %44 : vector<1x32x4xbf16> to vector<32x4xbf16>
    %cst_31 = arith.constant dense<0.000000e+00> : vector<8x4xf32>
    %46 = tpu.matmul %1, %45, %cst_31 {dimension_numbers = #tpu.dot_dimension_numbers<[1], [0], [0], [1], [0, 0, 1, 1], [], []>} : vector<8x32xbf16>, vector<32x4xbf16>, vector<8x4xf32> -> vector<8x4xf32>
    %c1_32 = arith.constant 1 : index
    %c0_33 = arith.constant 0 : index
    %c0_34 = arith.constant 0 : index
    %47 = vector.load %arg5[%c1_32, %c0_33, %c0_34] : memref<8x32x4xbf16, #tpu.memory_space<vmem>>, vector<1x32x4xbf16>
    %48 = vector.shape_cast %47 : vector<1x32x4xbf16> to vector<32x4xbf16>
    %cst_35 = arith.constant dense<0.000000e+00> : vector<8x4xf32>
    %49 = tpu.matmul %1, %48, %cst_35 {dimension_numbers = #tpu.dot_dimension_numbers<[1], [0], [0], [1], [0, 0, 1, 1], [], []>} : vector<8x32xbf16>, vector<32x4xbf16>, vector<8x4xf32> -> vector<8x4xf32>
    %50 = vector.shape_cast %43 : vector<8x4xf32> to vector<1x8x4xf32>
    %51 = arith.truncf %50 : vector<1x8x4xf32> to vector<1x8x4xbf16>
    %52 = vector.shape_cast %46 : vector<8x4xf32> to vector<1x8x4xf32>
    %53 = arith.truncf %52 : vector<1x8x4xf32> to vector<1x8x4xbf16>
    %54 = vector.shape_cast %49 : vector<8x4xf32> to vector<1x8x4xf32>
    %55 = arith.truncf %54 : vector<1x8x4xf32> to vector<1x8x4xbf16>
    "tpu.trace_start"() <{level = 10 : i32, message = "bnk,bmk->bnm"}> : () -> ()
    %cst_36 = arith.constant dense<0.000000e+00> : vector<1x8x8xf32>
    %56 = tpu.matmul %51, %53, %cst_36 {dimension_numbers = #tpu.dot_dimension_numbers<[2], [2], [1], [1], [0, 0, 0, 1, 1, 1], [0], [0]>} : vector<1x8x4xbf16>, vector<1x8x4xbf16>, vector<1x8x8xf32> -> vector<1x8x8xf32>
    "tpu.trace_stop"() : () -> ()
    %cst_37 = arith.constant 5.000000e-01 : f32
    %57 = vector.broadcast %cst_37 : f32 to vector<1x8x8xf32>
    %58 = arith.mulf %56, %57 : vector<1x8x8xf32>
    %59 = arith.addf %58, %2 : vector<1x8x8xf32>
    %cst_38 = arith.constant dense<0xFF800000> : vector<1x8xf32>
    %60 = vector.multi_reduction <maximumf>, %59, %cst_38 [2] : vector<1x8x8xf32> to vector<1x8xf32>
    %61 = vector.shape_cast %60 : vector<1x8xf32> to vector<1x8x1xf32>
    %62 = vector.broadcast %61 : vector<1x8x1xf32> to vector<1x8x8xf32>
    %63 = arith.subf %59, %62 : vector<1x8x8xf32>
    %64 = math.exp %63 : vector<1x8x8xf32>
    %cst_39 = arith.constant dense<0.000000e+00> : vector<1x8xf32>
    %65 = vector.multi_reduction <add>, %64, %cst_39 [2] : vector<1x8x8xf32> to vector<1x8xf32>
    %66 = vector.shape_cast %65 : vector<1x8xf32> to vector<1x8x1xf32>
    %67 = tpu.reciprocal %66 {approx = true} : vector<1x8x1xf32> -> vector<1x8x1xf32>
    %68 = vector.broadcast %67 : vector<1x8x1xf32> to vector<1x8x8xf32>
    %69 = arith.mulf %64, %68 : vector<1x8x8xf32>
    %70 = arith.truncf %69 : vector<1x8x8xf32> to vector<1x8x8xbf16>
    "tpu.trace_start"() <{level = 10 : i32, message = "bnm,bmk->bnk"}> : () -> ()
    %cst_40 = arith.constant dense<0.000000e+00> : vector<1x8x4xf32>
    %71 = tpu.matmul %70, %55, %cst_40 {dimension_numbers = #tpu.dot_dimension_numbers<[2], [1], [1], [2], [0, 0, 0, 1, 1, 2], [0], [0]>} : vector<1x8x8xbf16>, vector<1x8x4xbf16>, vector<1x8x4xf32> -> vector<1x8x4xf32>
    "tpu.trace_stop"() : () -> ()
    %72 = vector.shape_cast %71 : vector<1x8x4xf32> to vector<8x4xf32>
    %73 = arith.truncf %72 : vector<8x4xf32> to vector<8x4xbf16>
    %c1_41 = arith.constant 1 : index
    %c0_42 = arith.constant 0 : index
    %c0_43 = arith.constant 0 : index
    %74 = vector.load %arg6[%c1_41, %c0_42, %c0_43] : memref<8x4x32xbf16, #tpu.memory_space<vmem>>, vector<1x4x32xbf16>
    %75 = vector.shape_cast %74 : vector<1x4x32xbf16> to vector<4x32xbf16>
    %cst_44 = arith.constant dense<0.000000e+00> : vector<8x32xf32>
    %76 = tpu.matmul %73, %75, %cst_44 {dimension_numbers = #tpu.dot_dimension_numbers<[1], [0], [0], [1], [0, 0, 1, 1], [], []>} : vector<8x4xbf16>, vector<4x32xbf16>, vector<8x32xf32> -> vector<8x32xf32>
    %77 = arith.addf %40, %76 : vector<8x32xf32>
    %c2 = arith.constant 2 : index
    %c0_45 = arith.constant 0 : index
    %c0_46 = arith.constant 0 : index
    %78 = vector.load %arg3[%c2, %c0_45, %c0_46] : memref<8x32x4xbf16, #tpu.memory_space<vmem>>, vector<1x32x4xbf16>
    %79 = vector.shape_cast %78 : vector<1x32x4xbf16> to vector<32x4xbf16>
    %cst_47 = arith.constant dense<0.000000e+00> : vector<8x4xf32>
    %80 = tpu.matmul %1, %79, %cst_47 {dimension_numbers = #tpu.dot_dimension_numbers<[1], [0], [0], [1], [0, 0, 1, 1], [], []>} : vector<8x32xbf16>, vector<32x4xbf16>, vector<8x4xf32> -> vector<8x4xf32>
    %c2_48 = arith.constant 2 : index
    %c0_49 = arith.constant 0 : index
    %c0_50 = arith.constant 0 : index
    %81 = vector.load %arg4[%c2_48, %c0_49, %c0_50] : memref<8x32x4xbf16, #tpu.memory_space<vmem>>, vector<1x32x4xbf16>
    %82 = vector.shape_cast %81 : vector<1x32x4xbf16> to vector<32x4xbf16>
    %cst_51 = arith.constant dense<0.000000e+00> : vector<8x4xf32>
    %83 = tpu.matmul %1, %82, %cst_51 {dimension_numbers = #tpu.dot_dimension_numbers<[1], [0], [0], [1], [0, 0, 1, 1], [], []>} : vector<8x32xbf16>, vector<32x4xbf16>, vector<8x4xf32> -> vector<8x4xf32>
    %c2_52 = arith.constant 2 : index
    %c0_53 = arith.constant 0 : index
    %c0_54 = arith.constant 0 : index
    %84 = vector.load %arg5[%c2_52, %c0_53, %c0_54] : memref<8x32x4xbf16, #tpu.memory_space<vmem>>, vector<1x32x4xbf16>
    %85 = vector.shape_cast %84 : vector<1x32x4xbf16> to vector<32x4xbf16>
    %cst_55 = arith.constant dense<0.000000e+00> : vector<8x4xf32>
    %86 = tpu.matmul %1, %85, %cst_55 {dimension_numbers = #tpu.dot_dimension_numbers<[1], [0], [0], [1], [0, 0, 1, 1], [], []>} : vector<8x32xbf16>, vector<32x4xbf16>, vector<8x4xf32> -> vector<8x4xf32>
    %87 = vector.shape_cast %80 : vector<8x4xf32> to vector<1x8x4xf32>
    %88 = arith.truncf %87 : vector<1x8x4xf32> to vector<1x8x4xbf16>
    %89 = vector.shape_cast %83 : vector<8x4xf32> to vector<1x8x4xf32>
    %90 = arith.truncf %89 : vector<1x8x4xf32> to vector<1x8x4xbf16>
    %91 = vector.shape_cast %86 : vector<8x4xf32> to vector<1x8x4xf32>
    %92 = arith.truncf %91 : vector<1x8x4xf32> to vector<1x8x4xbf16>
    "tpu.trace_start"() <{level = 10 : i32, message = "bnk,bmk->bnm"}> : () -> ()
    %cst_56 = arith.constant dense<0.000000e+00> : vector<1x8x8xf32>
    %93 = tpu.matmul %88, %90, %cst_56 {dimension_numbers = #tpu.dot_dimension_numbers<[2], [2], [1], [1], [0, 0, 0, 1, 1, 1], [0], [0]>} : vector<1x8x4xbf16>, vector<1x8x4xbf16>, vector<1x8x8xf32> -> vector<1x8x8xf32>
    "tpu.trace_stop"() : () -> ()
    %cst_57 = arith.constant 5.000000e-01 : f32
    %94 = vector.broadcast %cst_57 : f32 to vector<1x8x8xf32>
    %95 = arith.mulf %93, %94 : vector<1x8x8xf32>
    %96 = arith.addf %95, %2 : vector<1x8x8xf32>
    %cst_58 = arith.constant dense<0xFF800000> : vector<1x8xf32>
    %97 = vector.multi_reduction <maximumf>, %96, %cst_58 [2] : vector<1x8x8xf32> to vector<1x8xf32>
    %98 = vector.shape_cast %97 : vector<1x8xf32> to vector<1x8x1xf32>
    %99 = vector.broadcast %98 : vector<1x8x1xf32> to vector<1x8x8xf32>
    %100 = arith.subf %96, %99 : vector<1x8x8xf32>
    %101 = math.exp %100 : vector<1x8x8xf32>
    %cst_59 = arith.constant dense<0.000000e+00> : vector<1x8xf32>
    %102 = vector.multi_reduction <add>, %101, %cst_59 [2] : vector<1x8x8xf32> to vector<1x8xf32>
    %103 = vector.shape_cast %102 : vector<1x8xf32> to vector<1x8x1xf32>
    %104 = tpu.reciprocal %103 {approx = true} : vector<1x8x1xf32> -> vector<1x8x1xf32>
    %105 = vector.broadcast %104 : vector<1x8x1xf32> to vector<1x8x8xf32>
    %106 = arith.mulf %101, %105 : vector<1x8x8xf32>
    %107 = arith.truncf %106 : vector<1x8x8xf32> to vector<1x8x8xbf16>
    "tpu.trace_start"() <{level = 10 : i32, message = "bnm,bmk->bnk"}> : () -> ()
    %cst_60 = arith.constant dense<0.000000e+00> : vector<1x8x4xf32>
    %108 = tpu.matmul %107, %92, %cst_60 {dimension_numbers = #tpu.dot_dimension_numbers<[2], [1], [1], [2], [0, 0, 0, 1, 1, 2], [0], [0]>} : vector<1x8x8xbf16>, vector<1x8x4xbf16>, vector<1x8x4xf32> -> vector<1x8x4xf32>
    "tpu.trace_stop"() : () -> ()
    %109 = vector.shape_cast %108 : vector<1x8x4xf32> to vector<8x4xf32>
    %110 = arith.truncf %109 : vector<8x4xf32> to vector<8x4xbf16>
    %c2_61 = arith.constant 2 : index
    %c0_62 = arith.constant 0 : index
    %c0_63 = arith.constant 0 : index
    %111 = vector.load %arg6[%c2_61, %c0_62, %c0_63] : memref<8x4x32xbf16, #tpu.memory_space<vmem>>, vector<1x4x32xbf16>
    %112 = vector.shape_cast %111 : vector<1x4x32xbf16> to vector<4x32xbf16>
    %cst_64 = arith.constant dense<0.000000e+00> : vector<8x32xf32>
    %113 = tpu.matmul %110, %112, %cst_64 {dimension_numbers = #tpu.dot_dimension_numbers<[1], [0], [0], [1], [0, 0, 1, 1], [], []>} : vector<8x4xbf16>, vector<4x32xbf16>, vector<8x32xf32> -> vector<8x32xf32>
    %114 = arith.addf %77, %113 : vector<8x32xf32>
    %c3 = arith.constant 3 : index
    %c0_65 = arith.constant 0 : index
    %c0_66 = arith.constant 0 : index
    %115 = vector.load %arg3[%c3, %c0_65, %c0_66] : memref<8x32x4xbf16, #tpu.memory_space<vmem>>, vector<1x32x4xbf16>
    %116 = vector.shape_cast %115 : vector<1x32x4xbf16> to vector<32x4xbf16>
    %cst_67 = arith.constant dense<0.000000e+00> : vector<8x4xf32>
    %117 = tpu.matmul %1, %116, %cst_67 {dimension_numbers = #tpu.dot_dimension_numbers<[1], [0], [0], [1], [0, 0, 1, 1], [], []>} : vector<8x32xbf16>, vector<32x4xbf16>, vector<8x4xf32> -> vector<8x4xf32>
    %c3_68 = arith.constant 3 : index
    %c0_69 = arith.constant 0 : index
    %c0_70 = arith.constant 0 : index
    %118 = vector.load %arg4[%c3_68, %c0_69, %c0_70] : memref<8x32x4xbf16, #tpu.memory_space<vmem>>, vector<1x32x4xbf16>
    %119 = vector.shape_cast %118 : vector<1x32x4xbf16> to vector<32x4xbf16>
    %cst_71 = arith.constant dense<0.000000e+00> : vector<8x4xf32>
    %120 = tpu.matmul %1, %119, %cst_71 {dimension_numbers = #tpu.dot_dimension_numbers<[1], [0], [0], [1], [0, 0, 1, 1], [], []>} : vector<8x32xbf16>, vector<32x4xbf16>, vector<8x4xf32> -> vector<8x4xf32>
    %c3_72 = arith.constant 3 : index
    %c0_73 = arith.constant 0 : index
    %c0_74 = arith.constant 0 : index
    %121 = vector.load %arg5[%c3_72, %c0_73, %c0_74] : memref<8x32x4xbf16, #tpu.memory_space<vmem>>, vector<1x32x4xbf16>
    %122 = vector.shape_cast %121 : vector<1x32x4xbf16> to vector<32x4xbf16>
    %cst_75 = arith.constant dense<0.000000e+00> : vector<8x4xf32>
    %123 = tpu.matmul %1, %122, %cst_75 {dimension_numbers = #tpu.dot_dimension_numbers<[1], [0], [0], [1], [0, 0, 1, 1], [], []>} : vector<8x32xbf16>, vector<32x4xbf16>, vector<8x4xf32> -> vector<8x4xf32>
    %124 = vector.shape_cast %117 : vector<8x4xf32> to vector<1x8x4xf32>
    %125 = arith.truncf %124 : vector<1x8x4xf32> to vector<1x8x4xbf16>
    %126 = vector.shape_cast %120 : vector<8x4xf32> to vector<1x8x4xf32>
    %127 = arith.truncf %126 : vector<1x8x4xf32> to vector<1x8x4xbf16>
    %128 = vector.shape_cast %123 : vector<8x4xf32> to vector<1x8x4xf32>
    %129 = arith.truncf %128 : vector<1x8x4xf32> to vector<1x8x4xbf16>
    "tpu.trace_start"() <{level = 10 : i32, message = "bnk,bmk->bnm"}> : () -> ()
    %cst_76 = arith.constant dense<0.000000e+00> : vector<1x8x8xf32>
    %130 = tpu.matmul %125, %127, %cst_76 {dimension_numbers = #tpu.dot_dimension_numbers<[2], [2], [1], [1], [0, 0, 0, 1, 1, 1], [0], [0]>} : vector<1x8x4xbf16>, vector<1x8x4xbf16>, vector<1x8x8xf32> -> vector<1x8x8xf32>
    "tpu.trace_stop"() : () -> ()
    %cst_77 = arith.constant 5.000000e-01 : f32
    %131 = vector.broadcast %cst_77 : f32 to vector<1x8x8xf32>
    %132 = arith.mulf %130, %131 : vector<1x8x8xf32>
    %133 = arith.addf %132, %2 : vector<1x8x8xf32>
    %cst_78 = arith.constant dense<0xFF800000> : vector<1x8xf32>
    %134 = vector.multi_reduction <maximumf>, %133, %cst_78 [2] : vector<1x8x8xf32> to vector<1x8xf32>
    %135 = vector.shape_cast %134 : vector<1x8xf32> to vector<1x8x1xf32>
    %136 = vector.broadcast %135 : vector<1x8x1xf32> to vector<1x8x8xf32>
    %137 = arith.subf %133, %136 : vector<1x8x8xf32>
    %138 = math.exp %137 : vector<1x8x8xf32>
    %cst_79 = arith.constant dense<0.000000e+00> : vector<1x8xf32>
    %139 = vector.multi_reduction <add>, %138, %cst_79 [2] : vector<1x8x8xf32> to vector<1x8xf32>
    %140 = vector.shape_cast %139 : vector<1x8xf32> to vector<1x8x1xf32>
    %141 = tpu.reciprocal %140 {approx = true} : vector<1x8x1xf32> -> vector<1x8x1xf32>
    %142 = vector.broadcast %141 : vector<1x8x1xf32> to vector<1x8x8xf32>
    %143 = arith.mulf %138, %142 : vector<1x8x8xf32>
    %144 = arith.truncf %143 : vector<1x8x8xf32> to vector<1x8x8xbf16>
    "tpu.trace_start"() <{level = 10 : i32, message = "bnm,bmk->bnk"}> : () -> ()
    %cst_80 = arith.constant dense<0.000000e+00> : vector<1x8x4xf32>
    %145 = tpu.matmul %144, %129, %cst_80 {dimension_numbers = #tpu.dot_dimension_numbers<[2], [1], [1], [2], [0, 0, 0, 1, 1, 2], [0], [0]>} : vector<1x8x8xbf16>, vector<1x8x4xbf16>, vector<1x8x4xf32> -> vector<1x8x4xf32>
    "tpu.trace_stop"() : () -> ()
    %146 = vector.shape_cast %145 : vector<1x8x4xf32> to vector<8x4xf32>
    %147 = arith.truncf %146 : vector<8x4xf32> to vector<8x4xbf16>
    %c3_81 = arith.constant 3 : index
    %c0_82 = arith.constant 0 : index
    %c0_83 = arith.constant 0 : index
    %148 = vector.load %arg6[%c3_81, %c0_82, %c0_83] : memref<8x4x32xbf16, #tpu.memory_space<vmem>>, vector<1x4x32xbf16>
    %149 = vector.shape_cast %148 : vector<1x4x32xbf16> to vector<4x32xbf16>
    %cst_84 = arith.constant dense<0.000000e+00> : vector<8x32xf32>
    %150 = tpu.matmul %147, %149, %cst_84 {dimension_numbers = #tpu.dot_dimension_numbers<[1], [0], [0], [1], [0, 0, 1, 1], [], []>} : vector<8x4xbf16>, vector<4x32xbf16>, vector<8x32xf32> -> vector<8x32xf32>
    %151 = arith.addf %114, %150 : vector<8x32xf32>
    %c4 = arith.constant 4 : index
    %c0_85 = arith.constant 0 : index
    %c0_86 = arith.constant 0 : index
    %152 = vector.load %arg3[%c4, %c0_85, %c0_86] : memref<8x32x4xbf16, #tpu.memory_space<vmem>>, vector<1x32x4xbf16>
    %153 = vector.shape_cast %152 : vector<1x32x4xbf16> to vector<32x4xbf16>
    %cst_87 = arith.constant dense<0.000000e+00> : vector<8x4xf32>
    %154 = tpu.matmul %1, %153, %cst_87 {dimension_numbers = #tpu.dot_dimension_numbers<[1], [0], [0], [1], [0, 0, 1, 1], [], []>} : vector<8x32xbf16>, vector<32x4xbf16>, vector<8x4xf32> -> vector<8x4xf32>
    %c4_88 = arith.constant 4 : index
    %c0_89 = arith.constant 0 : index
    %c0_90 = arith.constant 0 : index
    %155 = vector.load %arg4[%c4_88, %c0_89, %c0_90] : memref<8x32x4xbf16, #tpu.memory_space<vmem>>, vector<1x32x4xbf16>
    %156 = vector.shape_cast %155 : vector<1x32x4xbf16> to vector<32x4xbf16>
    %cst_91 = arith.constant dense<0.000000e+00> : vector<8x4xf32>
    %157 = tpu.matmul %1, %156, %cst_91 {dimension_numbers = #tpu.dot_dimension_numbers<[1], [0], [0], [1], [0, 0, 1, 1], [], []>} : vector<8x32xbf16>, vector<32x4xbf16>, vector<8x4xf32> -> vector<8x4xf32>
    %c4_92 = arith.constant 4 : index
    %c0_93 = arith.constant 0 : index
    %c0_94 = arith.constant 0 : index
    %158 = vector.load %arg5[%c4_92, %c0_93, %c0_94] : memref<8x32x4xbf16, #tpu.memory_space<vmem>>, vector<1x32x4xbf16>
    %159 = vector.shape_cast %158 : vector<1x32x4xbf16> to vector<32x4xbf16>
    %cst_95 = arith.constant dense<0.000000e+00> : vector<8x4xf32>
    %160 = tpu.matmul %1, %159, %cst_95 {dimension_numbers = #tpu.dot_dimension_numbers<[1], [0], [0], [1], [0, 0, 1, 1], [], []>} : vector<8x32xbf16>, vector<32x4xbf16>, vector<8x4xf32> -> vector<8x4xf32>
    %161 = vector.shape_cast %154 : vector<8x4xf32> to vector<1x8x4xf32>
    %162 = arith.truncf %161 : vector<1x8x4xf32> to vector<1x8x4xbf16>
    %163 = vector.shape_cast %157 : vector<8x4xf32> to vector<1x8x4xf32>
    %164 = arith.truncf %163 : vector<1x8x4xf32> to vector<1x8x4xbf16>
    %165 = vector.shape_cast %160 : vector<8x4xf32> to vector<1x8x4xf32>
    %166 = arith.truncf %165 : vector<1x8x4xf32> to vector<1x8x4xbf16>
    "tpu.trace_start"() <{level = 10 : i32, message = "bnk,bmk->bnm"}> : () -> ()
    %cst_96 = arith.constant dense<0.000000e+00> : vector<1x8x8xf32>
    %167 = tpu.matmul %162, %164, %cst_96 {dimension_numbers = #tpu.dot_dimension_numbers<[2], [2], [1], [1], [0, 0, 0, 1, 1, 1], [0], [0]>} : vector<1x8x4xbf16>, vector<1x8x4xbf16>, vector<1x8x8xf32> -> vector<1x8x8xf32>
    "tpu.trace_stop"() : () -> ()
    %cst_97 = arith.constant 5.000000e-01 : f32
    %168 = vector.broadcast %cst_97 : f32 to vector<1x8x8xf32>
    %169 = arith.mulf %167, %168 : vector<1x8x8xf32>
    %170 = arith.addf %169, %2 : vector<1x8x8xf32>
    %cst_98 = arith.constant dense<0xFF800000> : vector<1x8xf32>
    %171 = vector.multi_reduction <maximumf>, %170, %cst_98 [2] : vector<1x8x8xf32> to vector<1x8xf32>
    %172 = vector.shape_cast %171 : vector<1x8xf32> to vector<1x8x1xf32>
    %173 = vector.broadcast %172 : vector<1x8x1xf32> to vector<1x8x8xf32>
    %174 = arith.subf %170, %173 : vector<1x8x8xf32>
    %175 = math.exp %174 : vector<1x8x8xf32>
    %cst_99 = arith.constant dense<0.000000e+00> : vector<1x8xf32>
    %176 = vector.multi_reduction <add>, %175, %cst_99 [2] : vector<1x8x8xf32> to vector<1x8xf32>
    %177 = vector.shape_cast %176 : vector<1x8xf32> to vector<1x8x1xf32>
    %178 = tpu.reciprocal %177 {approx = true} : vector<1x8x1xf32> -> vector<1x8x1xf32>
    %179 = vector.broadcast %178 : vector<1x8x1xf32> to vector<1x8x8xf32>
    %180 = arith.mulf %175, %179 : vector<1x8x8xf32>
    %181 = arith.truncf %180 : vector<1x8x8xf32> to vector<1x8x8xbf16>
    "tpu.trace_start"() <{level = 10 : i32, message = "bnm,bmk->bnk"}> : () -> ()
    %cst_100 = arith.constant dense<0.000000e+00> : vector<1x8x4xf32>
    %182 = tpu.matmul %181, %166, %cst_100 {dimension_numbers = #tpu.dot_dimension_numbers<[2], [1], [1], [2], [0, 0, 0, 1, 1, 2], [0], [0]>} : vector<1x8x8xbf16>, vector<1x8x4xbf16>, vector<1x8x4xf32> -> vector<1x8x4xf32>
    "tpu.trace_stop"() : () -> ()
    %183 = vector.shape_cast %182 : vector<1x8x4xf32> to vector<8x4xf32>
    %184 = arith.truncf %183 : vector<8x4xf32> to vector<8x4xbf16>
    %c4_101 = arith.constant 4 : index
    %c0_102 = arith.constant 0 : index
    %c0_103 = arith.constant 0 : index
    %185 = vector.load %arg6[%c4_101, %c0_102, %c0_103] : memref<8x4x32xbf16, #tpu.memory_space<vmem>>, vector<1x4x32xbf16>
    %186 = vector.shape_cast %185 : vector<1x4x32xbf16> to vector<4x32xbf16>
    %cst_104 = arith.constant dense<0.000000e+00> : vector<8x32xf32>
    %187 = tpu.matmul %184, %186, %cst_104 {dimension_numbers = #tpu.dot_dimension_numbers<[1], [0], [0], [1], [0, 0, 1, 1], [], []>} : vector<8x4xbf16>, vector<4x32xbf16>, vector<8x32xf32> -> vector<8x32xf32>
    %188 = arith.addf %151, %187 : vector<8x32xf32>
    %c5 = arith.constant 5 : index
    %c0_105 = arith.constant 0 : index
    %c0_106 = arith.constant 0 : index
    %189 = vector.load %arg3[%c5, %c0_105, %c0_106] : memref<8x32x4xbf16, #tpu.memory_space<vmem>>, vector<1x32x4xbf16>
    %190 = vector.shape_cast %189 : vector<1x32x4xbf16> to vector<32x4xbf16>
    %cst_107 = arith.constant dense<0.000000e+00> : vector<8x4xf32>
    %191 = tpu.matmul %1, %190, %cst_107 {dimension_numbers = #tpu.dot_dimension_numbers<[1], [0], [0], [1], [0, 0, 1, 1], [], []>} : vector<8x32xbf16>, vector<32x4xbf16>, vector<8x4xf32> -> vector<8x4xf32>
    %c5_108 = arith.constant 5 : index
    %c0_109 = arith.constant 0 : index
    %c0_110 = arith.constant 0 : index
    %192 = vector.load %arg4[%c5_108, %c0_109, %c0_110] : memref<8x32x4xbf16, #tpu.memory_space<vmem>>, vector<1x32x4xbf16>
    %193 = vector.shape_cast %192 : vector<1x32x4xbf16> to vector<32x4xbf16>
    %cst_111 = arith.constant dense<0.000000e+00> : vector<8x4xf32>
    %194 = tpu.matmul %1, %193, %cst_111 {dimension_numbers = #tpu.dot_dimension_numbers<[1], [0], [0], [1], [0, 0, 1, 1], [], []>} : vector<8x32xbf16>, vector<32x4xbf16>, vector<8x4xf32> -> vector<8x4xf32>
    %c5_112 = arith.constant 5 : index
    %c0_113 = arith.constant 0 : index
    %c0_114 = arith.constant 0 : index
    %195 = vector.load %arg5[%c5_112, %c0_113, %c0_114] : memref<8x32x4xbf16, #tpu.memory_space<vmem>>, vector<1x32x4xbf16>
    %196 = vector.shape_cast %195 : vector<1x32x4xbf16> to vector<32x4xbf16>
    %cst_115 = arith.constant dense<0.000000e+00> : vector<8x4xf32>
    %197 = tpu.matmul %1, %196, %cst_115 {dimension_numbers = #tpu.dot_dimension_numbers<[1], [0], [0], [1], [0, 0, 1, 1], [], []>} : vector<8x32xbf16>, vector<32x4xbf16>, vector<8x4xf32> -> vector<8x4xf32>
    %198 = vector.shape_cast %191 : vector<8x4xf32> to vector<1x8x4xf32>
    %199 = arith.truncf %198 : vector<1x8x4xf32> to vector<1x8x4xbf16>
    %200 = vector.shape_cast %194 : vector<8x4xf32> to vector<1x8x4xf32>
    %201 = arith.truncf %200 : vector<1x8x4xf32> to vector<1x8x4xbf16>
    %202 = vector.shape_cast %197 : vector<8x4xf32> to vector<1x8x4xf32>
    %203 = arith.truncf %202 : vector<1x8x4xf32> to vector<1x8x4xbf16>
    "tpu.trace_start"() <{level = 10 : i32, message = "bnk,bmk->bnm"}> : () -> ()
    %cst_116 = arith.constant dense<0.000000e+00> : vector<1x8x8xf32>
    %204 = tpu.matmul %199, %201, %cst_116 {dimension_numbers = #tpu.dot_dimension_numbers<[2], [2], [1], [1], [0, 0, 0, 1, 1, 1], [0], [0]>} : vector<1x8x4xbf16>, vector<1x8x4xbf16>, vector<1x8x8xf32> -> vector<1x8x8xf32>
    "tpu.trace_stop"() : () -> ()
    %cst_117 = arith.constant 5.000000e-01 : f32
    %205 = vector.broadcast %cst_117 : f32 to vector<1x8x8xf32>
    %206 = arith.mulf %204, %205 : vector<1x8x8xf32>
    %207 = arith.addf %206, %2 : vector<1x8x8xf32>
    %cst_118 = arith.constant dense<0xFF800000> : vector<1x8xf32>
    %208 = vector.multi_reduction <maximumf>, %207, %cst_118 [2] : vector<1x8x8xf32> to vector<1x8xf32>
    %209 = vector.shape_cast %208 : vector<1x8xf32> to vector<1x8x1xf32>
    %210 = vector.broadcast %209 : vector<1x8x1xf32> to vector<1x8x8xf32>
    %211 = arith.subf %207, %210 : vector<1x8x8xf32>
    %212 = math.exp %211 : vector<1x8x8xf32>
    %cst_119 = arith.constant dense<0.000000e+00> : vector<1x8xf32>
    %213 = vector.multi_reduction <add>, %212, %cst_119 [2] : vector<1x8x8xf32> to vector<1x8xf32>
    %214 = vector.shape_cast %213 : vector<1x8xf32> to vector<1x8x1xf32>
    %215 = tpu.reciprocal %214 {approx = true} : vector<1x8x1xf32> -> vector<1x8x1xf32>
    %216 = vector.broadcast %215 : vector<1x8x1xf32> to vector<1x8x8xf32>
    %217 = arith.mulf %212, %216 : vector<1x8x8xf32>
    %218 = arith.truncf %217 : vector<1x8x8xf32> to vector<1x8x8xbf16>
    "tpu.trace_start"() <{level = 10 : i32, message = "bnm,bmk->bnk"}> : () -> ()
    %cst_120 = arith.constant dense<0.000000e+00> : vector<1x8x4xf32>
    %219 = tpu.matmul %218, %203, %cst_120 {dimension_numbers = #tpu.dot_dimension_numbers<[2], [1], [1], [2], [0, 0, 0, 1, 1, 2], [0], [0]>} : vector<1x8x8xbf16>, vector<1x8x4xbf16>, vector<1x8x4xf32> -> vector<1x8x4xf32>
    "tpu.trace_stop"() : () -> ()
    %220 = vector.shape_cast %219 : vector<1x8x4xf32> to vector<8x4xf32>
    %221 = arith.truncf %220 : vector<8x4xf32> to vector<8x4xbf16>
    %c5_121 = arith.constant 5 : index
    %c0_122 = arith.constant 0 : index
    %c0_123 = arith.constant 0 : index
    %222 = vector.load %arg6[%c5_121, %c0_122, %c0_123] : memref<8x4x32xbf16, #tpu.memory_space<vmem>>, vector<1x4x32xbf16>
    %223 = vector.shape_cast %222 : vector<1x4x32xbf16> to vector<4x32xbf16>
    %cst_124 = arith.constant dense<0.000000e+00> : vector<8x32xf32>
    %224 = tpu.matmul %221, %223, %cst_124 {dimension_numbers = #tpu.dot_dimension_numbers<[1], [0], [0], [1], [0, 0, 1, 1], [], []>} : vector<8x4xbf16>, vector<4x32xbf16>, vector<8x32xf32> -> vector<8x32xf32>
    %225 = arith.addf %188, %224 : vector<8x32xf32>
    %c6 = arith.constant 6 : index
    %c0_125 = arith.constant 0 : index
    %c0_126 = arith.constant 0 : index
    %226 = vector.load %arg3[%c6, %c0_125, %c0_126] : memref<8x32x4xbf16, #tpu.memory_space<vmem>>, vector<1x32x4xbf16>
    %227 = vector.shape_cast %226 : vector<1x32x4xbf16> to vector<32x4xbf16>
    %cst_127 = arith.constant dense<0.000000e+00> : vector<8x4xf32>
    %228 = tpu.matmul %1, %227, %cst_127 {dimension_numbers = #tpu.dot_dimension_numbers<[1], [0], [0], [1], [0, 0, 1, 1], [], []>} : vector<8x32xbf16>, vector<32x4xbf16>, vector<8x4xf32> -> vector<8x4xf32>
    %c6_128 = arith.constant 6 : index
    %c0_129 = arith.constant 0 : index
    %c0_130 = arith.constant 0 : index
    %229 = vector.load %arg4[%c6_128, %c0_129, %c0_130] : memref<8x32x4xbf16, #tpu.memory_space<vmem>>, vector<1x32x4xbf16>
    %230 = vector.shape_cast %229 : vector<1x32x4xbf16> to vector<32x4xbf16>
    %cst_131 = arith.constant dense<0.000000e+00> : vector<8x4xf32>
    %231 = tpu.matmul %1, %230, %cst_131 {dimension_numbers = #tpu.dot_dimension_numbers<[1], [0], [0], [1], [0, 0, 1, 1], [], []>} : vector<8x32xbf16>, vector<32x4xbf16>, vector<8x4xf32> -> vector<8x4xf32>
    %c6_132 = arith.constant 6 : index
    %c0_133 = arith.constant 0 : index
    %c0_134 = arith.constant 0 : index
    %232 = vector.load %arg5[%c6_132, %c0_133, %c0_134] : memref<8x32x4xbf16, #tpu.memory_space<vmem>>, vector<1x32x4xbf16>
    %233 = vector.shape_cast %232 : vector<1x32x4xbf16> to vector<32x4xbf16>
    %cst_135 = arith.constant dense<0.000000e+00> : vector<8x4xf32>
    %234 = tpu.matmul %1, %233, %cst_135 {dimension_numbers = #tpu.dot_dimension_numbers<[1], [0], [0], [1], [0, 0, 1, 1], [], []>} : vector<8x32xbf16>, vector<32x4xbf16>, vector<8x4xf32> -> vector<8x4xf32>
    %235 = vector.shape_cast %228 : vector<8x4xf32> to vector<1x8x4xf32>
    %236 = arith.truncf %235 : vector<1x8x4xf32> to vector<1x8x4xbf16>
    %237 = vector.shape_cast %231 : vector<8x4xf32> to vector<1x8x4xf32>
    %238 = arith.truncf %237 : vector<1x8x4xf32> to vector<1x8x4xbf16>
    %239 = vector.shape_cast %234 : vector<8x4xf32> to vector<1x8x4xf32>
    %240 = arith.truncf %239 : vector<1x8x4xf32> to vector<1x8x4xbf16>
    "tpu.trace_start"() <{level = 10 : i32, message = "bnk,bmk->bnm"}> : () -> ()
    %cst_136 = arith.constant dense<0.000000e+00> : vector<1x8x8xf32>
    %241 = tpu.matmul %236, %238, %cst_136 {dimension_numbers = #tpu.dot_dimension_numbers<[2], [2], [1], [1], [0, 0, 0, 1, 1, 1], [0], [0]>} : vector<1x8x4xbf16>, vector<1x8x4xbf16>, vector<1x8x8xf32> -> vector<1x8x8xf32>
    "tpu.trace_stop"() : () -> ()
    %cst_137 = arith.constant 5.000000e-01 : f32
    %242 = vector.broadcast %cst_137 : f32 to vector<1x8x8xf32>
    %243 = arith.mulf %241, %242 : vector<1x8x8xf32>
    %244 = arith.addf %243, %2 : vector<1x8x8xf32>
    %cst_138 = arith.constant dense<0xFF800000> : vector<1x8xf32>
    %245 = vector.multi_reduction <maximumf>, %244, %cst_138 [2] : vector<1x8x8xf32> to vector<1x8xf32>
    %246 = vector.shape_cast %245 : vector<1x8xf32> to vector<1x8x1xf32>
    %247 = vector.broadcast %246 : vector<1x8x1xf32> to vector<1x8x8xf32>
    %248 = arith.subf %244, %247 : vector<1x8x8xf32>
    %249 = math.exp %248 : vector<1x8x8xf32>
    %cst_139 = arith.constant dense<0.000000e+00> : vector<1x8xf32>
    %250 = vector.multi_reduction <add>, %249, %cst_139 [2] : vector<1x8x8xf32> to vector<1x8xf32>
    %251 = vector.shape_cast %250 : vector<1x8xf32> to vector<1x8x1xf32>
    %252 = tpu.reciprocal %251 {approx = true} : vector<1x8x1xf32> -> vector<1x8x1xf32>
    %253 = vector.broadcast %252 : vector<1x8x1xf32> to vector<1x8x8xf32>
    %254 = arith.mulf %249, %253 : vector<1x8x8xf32>
    %255 = arith.truncf %254 : vector<1x8x8xf32> to vector<1x8x8xbf16>
    "tpu.trace_start"() <{level = 10 : i32, message = "bnm,bmk->bnk"}> : () -> ()
    %cst_140 = arith.constant dense<0.000000e+00> : vector<1x8x4xf32>
    %256 = tpu.matmul %255, %240, %cst_140 {dimension_numbers = #tpu.dot_dimension_numbers<[2], [1], [1], [2], [0, 0, 0, 1, 1, 2], [0], [0]>} : vector<1x8x8xbf16>, vector<1x8x4xbf16>, vector<1x8x4xf32> -> vector<1x8x4xf32>
    "tpu.trace_stop"() : () -> ()
    %257 = vector.shape_cast %256 : vector<1x8x4xf32> to vector<8x4xf32>
    %258 = arith.truncf %257 : vector<8x4xf32> to vector<8x4xbf16>
    %c6_141 = arith.constant 6 : index
    %c0_142 = arith.constant 0 : index
    %c0_143 = arith.constant 0 : index
    %259 = vector.load %arg6[%c6_141, %c0_142, %c0_143] : memref<8x4x32xbf16, #tpu.memory_space<vmem>>, vector<1x4x32xbf16>
    %260 = vector.shape_cast %259 : vector<1x4x32xbf16> to vector<4x32xbf16>
    %cst_144 = arith.constant dense<0.000000e+00> : vector<8x32xf32>
    %261 = tpu.matmul %258, %260, %cst_144 {dimension_numbers = #tpu.dot_dimension_numbers<[1], [0], [0], [1], [0, 0, 1, 1], [], []>} : vector<8x4xbf16>, vector<4x32xbf16>, vector<8x32xf32> -> vector<8x32xf32>
    %262 = arith.addf %225, %261 : vector<8x32xf32>
    %c7 = arith.constant 7 : index
    %c0_145 = arith.constant 0 : index
    %c0_146 = arith.constant 0 : index
    %263 = vector.load %arg3[%c7, %c0_145, %c0_146] : memref<8x32x4xbf16, #tpu.memory_space<vmem>>, vector<1x32x4xbf16>
    %264 = vector.shape_cast %263 : vector<1x32x4xbf16> to vector<32x4xbf16>
    %cst_147 = arith.constant dense<0.000000e+00> : vector<8x4xf32>
    %265 = tpu.matmul %1, %264, %cst_147 {dimension_numbers = #tpu.dot_dimension_numbers<[1], [0], [0], [1], [0, 0, 1, 1], [], []>} : vector<8x32xbf16>, vector<32x4xbf16>, vector<8x4xf32> -> vector<8x4xf32>
    %c7_148 = arith.constant 7 : index
    %c0_149 = arith.constant 0 : index
    %c0_150 = arith.constant 0 : index
    %266 = vector.load %arg4[%c7_148, %c0_149, %c0_150] : memref<8x32x4xbf16, #tpu.memory_space<vmem>>, vector<1x32x4xbf16>
    %267 = vector.shape_cast %266 : vector<1x32x4xbf16> to vector<32x4xbf16>
    %cst_151 = arith.constant dense<0.000000e+00> : vector<8x4xf32>
    %268 = tpu.matmul %1, %267, %cst_151 {dimension_numbers = #tpu.dot_dimension_numbers<[1], [0], [0], [1], [0, 0, 1, 1], [], []>} : vector<8x32xbf16>, vector<32x4xbf16>, vector<8x4xf32> -> vector<8x4xf32>
    %c7_152 = arith.constant 7 : index
    %c0_153 = arith.constant 0 : index
    %c0_154 = arith.constant 0 : index
    %269 = vector.load %arg5[%c7_152, %c0_153, %c0_154] : memref<8x32x4xbf16, #tpu.memory_space<vmem>>, vector<1x32x4xbf16>
    %270 = vector.shape_cast %269 : vector<1x32x4xbf16> to vector<32x4xbf16>
    %cst_155 = arith.constant dense<0.000000e+00> : vector<8x4xf32>
    %271 = tpu.matmul %1, %270, %cst_155 {dimension_numbers = #tpu.dot_dimension_numbers<[1], [0], [0], [1], [0, 0, 1, 1], [], []>} : vector<8x32xbf16>, vector<32x4xbf16>, vector<8x4xf32> -> vector<8x4xf32>
    %272 = vector.shape_cast %265 : vector<8x4xf32> to vector<1x8x4xf32>
    %273 = arith.truncf %272 : vector<1x8x4xf32> to vector<1x8x4xbf16>
    %274 = vector.shape_cast %268 : vector<8x4xf32> to vector<1x8x4xf32>
    %275 = arith.truncf %274 : vector<1x8x4xf32> to vector<1x8x4xbf16>
    %276 = vector.shape_cast %271 : vector<8x4xf32> to vector<1x8x4xf32>
    %277 = arith.truncf %276 : vector<1x8x4xf32> to vector<1x8x4xbf16>
    "tpu.trace_start"() <{level = 10 : i32, message = "bnk,bmk->bnm"}> : () -> ()
    %cst_156 = arith.constant dense<0.000000e+00> : vector<1x8x8xf32>
    %278 = tpu.matmul %273, %275, %cst_156 {dimension_numbers = #tpu.dot_dimension_numbers<[2], [2], [1], [1], [0, 0, 0, 1, 1, 1], [0], [0]>} : vector<1x8x4xbf16>, vector<1x8x4xbf16>, vector<1x8x8xf32> -> vector<1x8x8xf32>
    "tpu.trace_stop"() : () -> ()
    %cst_157 = arith.constant 5.000000e-01 : f32
    %279 = vector.broadcast %cst_157 : f32 to vector<1x8x8xf32>
    %280 = arith.mulf %278, %279 : vector<1x8x8xf32>
    %281 = arith.addf %280, %2 : vector<1x8x8xf32>
    %cst_158 = arith.constant dense<0xFF800000> : vector<1x8xf32>
    %282 = vector.multi_reduction <maximumf>, %281, %cst_158 [2] : vector<1x8x8xf32> to vector<1x8xf32>
    %283 = vector.shape_cast %282 : vector<1x8xf32> to vector<1x8x1xf32>
    %284 = vector.broadcast %283 : vector<1x8x1xf32> to vector<1x8x8xf32>
    %285 = arith.subf %281, %284 : vector<1x8x8xf32>
    %286 = math.exp %285 : vector<1x8x8xf32>
    %cst_159 = arith.constant dense<0.000000e+00> : vector<1x8xf32>
    %287 = vector.multi_reduction <add>, %286, %cst_159 [2] : vector<1x8x8xf32> to vector<1x8xf32>
    %288 = vector.shape_cast %287 : vector<1x8xf32> to vector<1x8x1xf32>
    %289 = tpu.reciprocal %288 {approx = true} : vector<1x8x1xf32> -> vector<1x8x1xf32>
    %290 = vector.broadcast %289 : vector<1x8x1xf32> to vector<1x8x8xf32>
    %291 = arith.mulf %286, %290 : vector<1x8x8xf32>
    %292 = arith.truncf %291 : vector<1x8x8xf32> to vector<1x8x8xbf16>
    "tpu.trace_start"() <{level = 10 : i32, message = "bnm,bmk->bnk"}> : () -> ()
    %cst_160 = arith.constant dense<0.000000e+00> : vector<1x8x4xf32>
    %293 = tpu.matmul %292, %277, %cst_160 {dimension_numbers = #tpu.dot_dimension_numbers<[2], [1], [1], [2], [0, 0, 0, 1, 1, 2], [0], [0]>} : vector<1x8x8xbf16>, vector<1x8x4xbf16>, vector<1x8x4xf32> -> vector<1x8x4xf32>
    "tpu.trace_stop"() : () -> ()
    %294 = vector.shape_cast %293 : vector<1x8x4xf32> to vector<8x4xf32>
    %295 = arith.truncf %294 : vector<8x4xf32> to vector<8x4xbf16>
    %c7_161 = arith.constant 7 : index
    %c0_162 = arith.constant 0 : index
    %c0_163 = arith.constant 0 : index
    %296 = vector.load %arg6[%c7_161, %c0_162, %c0_163] : memref<8x4x32xbf16, #tpu.memory_space<vmem>>, vector<1x4x32xbf16>
    %297 = vector.shape_cast %296 : vector<1x4x32xbf16> to vector<4x32xbf16>
    %cst_164 = arith.constant dense<0.000000e+00> : vector<8x32xf32>
    %298 = tpu.matmul %295, %297, %cst_164 {dimension_numbers = #tpu.dot_dimension_numbers<[1], [0], [0], [1], [0, 0, 1, 1], [], []>} : vector<8x4xbf16>, vector<4x32xbf16>, vector<8x32xf32> -> vector<8x32xf32>
    %299 = arith.addf %262, %298 : vector<8x32xf32>
    %300 = arith.addf %0, %299 : vector<8x32xf32>
    %c0_165 = arith.constant 0 : index
    %c0_166 = arith.constant 0 : index
    %301 = vector.load %arg7[%c0_165, %c0_166] : memref<1x32xf32, #tpu.memory_space<vmem>>, vector<1x32xf32>
    %302 = vector.broadcast %301 : vector<1x32xf32> to vector<8x32xf32>
    %303 = arith.addf %300, %302 : vector<8x32xf32>
    %cst_167 = arith.constant dense<0.000000e+00> : vector<8xf32>
    %304 = vector.multi_reduction <add>, %303, %cst_167 [1] : vector<8x32xf32> to vector<8xf32>
    %305 = vector.shape_cast %304 : vector<8xf32> to vector<8x1xf32>
    %cst_168 = arith.constant 3.200000e+01 : f32
    %306 = vector.broadcast %cst_168 : f32 to vector<8x1xf32>
    %307 = arith.divf %305, %306 : vector<8x1xf32>
    %308 = vector.broadcast %307 : vector<8x1xf32> to vector<8x32xf32>
    %309 = arith.subf %303, %308 : vector<8x32xf32>
    %310 = arith.mulf %309, %309 : vector<8x32xf32>
    %cst_169 = arith.constant dense<0.000000e+00> : vector<8xf32>
    %311 = vector.multi_reduction <add>, %310, %cst_169 [1] : vector<8x32xf32> to vector<8xf32>
    %312 = vector.shape_cast %311 : vector<8xf32> to vector<8x1xf32>
    %cst_170 = arith.constant 3.200000e+01 : f32
    %313 = vector.broadcast %cst_170 : f32 to vector<8x1xf32>
    %314 = arith.divf %312, %313 : vector<8x1xf32>
    %315 = vector.broadcast %307 : vector<8x1xf32> to vector<8x32xf32>
    %316 = arith.subf %303, %315 : vector<8x32xf32>
    %cst_171 = arith.constant 9.99999974E-6 : f32
    %317 = vector.broadcast %cst_171 : f32 to vector<8x1xf32>
    %318 = arith.addf %314, %317 : vector<8x1xf32>
    %319 = math.rsqrt %318 : vector<8x1xf32>
    %320 = vector.broadcast %319 : vector<8x1xf32> to vector<8x32xf32>
    %321 = arith.mulf %316, %320 : vector<8x32xf32>
    %c0_172 = arith.constant 0 : index
    %c0_173 = arith.constant 0 : index
    %322 = vector.load %arg12[%c0_172, %c0_173] : memref<1x32xf32, #tpu.memory_space<vmem>>, vector<1x32xf32>
    %323 = vector.broadcast %322 : vector<1x32xf32> to vector<8x32xf32>
    %324 = arith.mulf %321, %323 : vector<8x32xf32>
    %c0_174 = arith.constant 0 : index
    %c0_175 = arith.constant 0 : index
    %325 = vector.load %arg13[%c0_174, %c0_175] : memref<1x32xf32, #tpu.memory_space<vmem>>, vector<1x32xf32>
    %326 = vector.broadcast %325 : vector<1x32xf32> to vector<8x32xf32>
    %327 = arith.addf %324, %326 : vector<8x32xf32>
    %328 = arith.truncf %327 : vector<8x32xf32> to vector<8x32xbf16>
    %c0_176 = arith.constant 0 : index
    %c0_177 = arith.constant 0 : index
    %329 = vector.load %arg8[%c0_176, %c0_177] : memref<32x128xbf16, #tpu.memory_space<vmem>>, vector<32x128xbf16>
    %cst_178 = arith.constant dense<0.000000e+00> : vector<8x128xf32>
    %330 = tpu.matmul %328, %329, %cst_178 {dimension_numbers = #tpu.dot_dimension_numbers<[1], [0], [0], [1], [0, 0, 1, 1], [], []>} : vector<8x32xbf16>, vector<32x128xbf16>, vector<8x128xf32> -> vector<8x128xf32>
    %c0_179 = arith.constant 0 : index
    %c0_180 = arith.constant 0 : index
    %331 = vector.load %arg9[%c0_179, %c0_180] : memref<1x128xf32, #tpu.memory_space<vmem>>, vector<1x128xf32>
    %332 = vector.broadcast %331 : vector<1x128xf32> to vector<8x128xf32>
    %333 = arith.addf %330, %332 : vector<8x128xf32>
    %cst_181 = arith.constant 0.000000e+00 : f32
    %334 = vector.broadcast %cst_181 : f32 to vector<8x128xf32>
    %335 = arith.maximumf %333, %334 : vector<8x128xf32>
    %336 = arith.truncf %335 : vector<8x128xf32> to vector<8x128xbf16>
    %c0_182 = arith.constant 0 : index
    %c0_183 = arith.constant 0 : index
    %337 = vector.load %arg10[%c0_182, %c0_183] : memref<128x32xbf16, #tpu.memory_space<vmem>>, vector<128x32xbf16>
    %cst_184 = arith.constant dense<0.000000e+00> : vector<8x32xf32>
    %338 = tpu.matmul %336, %337, %cst_184 {dimension_numbers = #tpu.dot_dimension_numbers<[1], [0], [0], [1], [0, 0, 1, 1], [], []>} : vector<8x128xbf16>, vector<128x32xbf16>, vector<8x32xf32> -> vector<8x32xf32>
    %c0_185 = arith.constant 0 : index
    %c0_186 = arith.constant 0 : index
    %339 = vector.load %arg11[%c0_185, %c0_186] : memref<1x32xf32, #tpu.memory_space<vmem>>, vector<1x32xf32>
    %340 = vector.broadcast %339 : vector<1x32xf32> to vector<8x32xf32>
    %341 = arith.addf %338, %340 : vector<8x32xf32>
    %342 = arith.addf %327, %341 : vector<8x32xf32>
    %cst_187 = arith.constant dense<0.000000e+00> : vector<8xf32>
    %343 = vector.multi_reduction <add>, %342, %cst_187 [1] : vector<8x32xf32> to vector<8xf32>
    %344 = vector.shape_cast %343 : vector<8xf32> to vector<8x1xf32>
    %cst_188 = arith.constant 3.200000e+01 : f32
    %345 = vector.broadcast %cst_188 : f32 to vector<8x1xf32>
    %346 = arith.divf %344, %345 : vector<8x1xf32>
    %347 = vector.broadcast %346 : vector<8x1xf32> to vector<8x32xf32>
    %348 = arith.subf %342, %347 : vector<8x32xf32>
    %349 = arith.mulf %348, %348 : vector<8x32xf32>
    %cst_189 = arith.constant dense<0.000000e+00> : vector<8xf32>
    %350 = vector.multi_reduction <add>, %349, %cst_189 [1] : vector<8x32xf32> to vector<8xf32>
    %351 = vector.shape_cast %350 : vector<8xf32> to vector<8x1xf32>
    %cst_190 = arith.constant 3.200000e+01 : f32
    %352 = vector.broadcast %cst_190 : f32 to vector<8x1xf32>
    %353 = arith.divf %351, %352 : vector<8x1xf32>
    %354 = vector.broadcast %346 : vector<8x1xf32> to vector<8x32xf32>
    %355 = arith.subf %342, %354 : vector<8x32xf32>
    %cst_191 = arith.constant 9.99999974E-6 : f32
    %356 = vector.broadcast %cst_191 : f32 to vector<8x1xf32>
    %357 = arith.addf %353, %356 : vector<8x1xf32>
    %358 = math.rsqrt %357 : vector<8x1xf32>
    %359 = vector.broadcast %358 : vector<8x1xf32> to vector<8x32xf32>
    %360 = arith.mulf %355, %359 : vector<8x32xf32>
    %c0_192 = arith.constant 0 : index
    %c0_193 = arith.constant 0 : index
    %361 = vector.load %arg14[%c0_192, %c0_193] : memref<1x32xf32, #tpu.memory_space<vmem>>, vector<1x32xf32>
    %362 = vector.broadcast %361 : vector<1x32xf32> to vector<8x32xf32>
    %363 = arith.mulf %360, %362 : vector<8x32xf32>
    %c0_194 = arith.constant 0 : index
    %c0_195 = arith.constant 0 : index
    %364 = vector.load %arg15[%c0_194, %c0_195] : memref<1x32xf32, #tpu.memory_space<vmem>>, vector<1x32xf32>
    %365 = vector.broadcast %364 : vector<1x32xf32> to vector<8x32xf32>
    %366 = arith.addf %363, %365 : vector<8x32xf32>
    %c0_196 = arith.constant 0 : index
    %c0_197 = arith.constant 0 : index
    %367 = vector.load %arg16[%c0_196, %c0_197] : memref<8x32xf32, #tpu.memory_space<vmem>>, vector<8x32xf32>
    tpu.vector_store %arg16[%c0_196, %c0_197], %366 {strides = array<i32>} : memref<8x32xf32, #tpu.memory_space<vmem>>, vector<8x32xf32>,
    return
  }
  func.func @transform_0(%arg0: i32) -> (i32, i32) {
    %c0_i32 = arith.constant 0 : i32
    %c0_i32_0 = arith.constant 0 : i32
    return %arg0, %c0_i32 : i32, i32
  }
  func.func @transform_1(%arg0: i32) -> (i32, i32, i32) {
    %c0_i32 = arith.constant 0 : i32
    %c0_i32_0 = arith.constant 0 : i32
    %c0_i32_1 = arith.constant 0 : i32
    return %arg0, %c0_i32, %c0_i32_0 : i32, i32, i32
  }
  func.func @transform_2(%arg0: i32) -> (i32, i32, i32) {
    %c0_i32 = arith.constant 0 : i32
    %c0_i32_0 = arith.constant 0 : i32
    %c0_i32_1 = arith.constant 0 : i32
    %c0_i32_2 = arith.constant 0 : i32
    return %c0_i32, %c0_i32_0, %c0_i32_1 : i32, i32, i32
  }
  func.func @transform_3(%arg0: i32) -> (i32, i32, i32) {
    %c0_i32 = arith.constant 0 : i32
    %c0_i32_0 = arith.constant 0 : i32
    %c0_i32_1 = arith.constant 0 : i32
    %c0_i32_2 = arith.constant 0 : i32
    return %c0_i32, %c0_i32_0, %c0_i32_1 : i32, i32, i32
  }
  func.func @transform_4(%arg0: i32) -> (i32, i32, i32) {
    %c0_i32 = arith.constant 0 : i32
    %c0_i32_0 = arith.constant 0 : i32
    %c0_i32_1 = arith.constant 0 : i32
    %c0_i32_2 = arith.constant 0 : i32
    return %c0_i32, %c0_i32_0, %c0_i32_1 : i32, i32, i32
  }
  func.func @transform_5(%arg0: i32) -> (i32, i32, i32) {
    %c0_i32 = arith.constant 0 : i32
    %c0_i32_0 = arith.constant 0 : i32
    %c0_i32_1 = arith.constant 0 : i32
    %c0_i32_2 = arith.constant 0 : i32
    return %c0_i32, %c0_i32_0, %c0_i32_1 : i32, i32, i32
  }
  func.func @transform_6(%arg0: i32) -> (i32, i32) {
    %c0_i32 = arith.constant 0 : i32
    %c0_i32_0 = arith.constant 0 : i32
    %c0_i32_1 = arith.constant 0 : i32
    return %c0_i32, %c0_i32_0 : i32, i32
  }
  func.func @transform_7(%arg0: i32) -> (i32, i32) {
    %c0_i32 = arith.constant 0 : i32
    %c0_i32_0 = arith.constant 0 : i32
    %c0_i32_1 = arith.constant 0 : i32
    return %c0_i32, %c0_i32_0 : i32, i32
  }
  func.func @transform_8(%arg0: i32) -> (i32, i32) {
    %c0_i32 = arith.constant 0 : i32
    %c0_i32_0 = arith.constant 0 : i32
    %c0_i32_1 = arith.constant 0 : i32
    return %c0_i32, %c0_i32_0 : i32, i32
  }
  func.func @transform_9(%arg0: i32) -> (i32, i32) {
    %c0_i32 = arith.constant 0 : i32
    %c0_i32_0 = arith.constant 0 : i32
    %c0_i32_1 = arith.constant 0 : i32
    return %c0_i32, %c0_i32_0 : i32, i32
  }
  func.func @transform_10(%arg0: i32) -> (i32, i32) {
    %c0_i32 = arith.constant 0 : i32
    %c0_i32_0 = arith.constant 0 : i32
    %c0_i32_1 = arith.constant 0 : i32
    return %c0_i32, %c0_i32_0 : i32, i32
  }
  func.func @transform_11(%arg0: i32) -> (i32, i32) {
    %c0_i32 = arith.constant 0 : i32
    %c0_i32_0 = arith.constant 0 : i32
    %c0_i32_1 = arith.constant 0 : i32
    return %c0_i32, %c0_i32_0 : i32, i32
  }
  func.func @transform_12(%arg0: i32) -> (i32, i32) {
    %c0_i32 = arith.constant 0 : i32
    %c0_i32_0 = arith.constant 0 : i32
    %c0_i32_1 = arith.constant 0 : i32
    return %c0_i32, %c0_i32_0 : i32, i32
  }
  func.func @transform_13(%arg0: i32) -> (i32, i32) {
    %c0_i32 = arith.constant 0 : i32
    %c0_i32_0 = arith.constant 0 : i32
    %c0_i32_1 = arith.constant 0 : i32
    return %c0_i32, %c0_i32_0 : i32, i32
  }
  func.func @transform_14(%arg0: i32) -> (i32, i32) {
    %c0_i32 = arith.constant 0 : i32
    %c0_i32_0 = arith.constant 0 : i32
    %c0_i32_1 = arith.constant 0 : i32
    return %c0_i32, %c0_i32_0 : i32, i32
  }
  func.func @transform_15(%arg0: i32) -> (i32, i32) {
    %c0_i32 = arith.constant 0 : i32
    %c0_i32_0 = arith.constant 0 : i32
    return %arg0, %c0_i32 : i32, i32
  }
}

</mosaic_0001>

<bundles_post_ra>
// kernel: tpu_custom_call.1
= control target key start
LH: loop header
LB: loop body
LE: loop exit
PB: predicated region body
PF: predicated region fallthrough
CT: control target
= control target key end

     0   :  { %s5145_s0 = inlined_call_operand.vmem [shape: f32[16,32], index: 0, kind: input, shape index: {}]   ;;  %s5146_s1 = inlined_call_operand.vmem [shape: f32[2,8,8], index: 1, kind: input, shape index: {}]   ;;  %s5147_s2 = inlined_call_operand.vmem [shape: bf16[8,32,4], index: 2, kind: input, shape index: {}]   ;;  %s5148_s3 = inlined_call_operand.vmem [shape: bf16[8,32,4], index: 3, kind: input, shape index: {}]   ;;  %s5149_s4 = inlined_call_operand.vmem [shape: bf16[8,32,4], index: 4, kind: input, shape index: {}]   ;;  %s5150_s5 = inlined_call_operand.vmem [shape: bf16[8,4,32], index: 5, kind: input, shape index: {}]   ;;  %s5151_s6 = inlined_call_operand.vmem [shape: f32[1,32], index: 6, kind: input, shape index: {}]   ;;  %s5152_s7 = inlined_call_operand.vmem [shape: bf16[32,128], index: 7, kind: input, shape index: {}]   ;;  %s5153_s8 = inlined_call_operand.vmem [shape: f32[1,128], index: 8, kind: input, shape index: {}]   ;;  %s5154_s9 = inlined_call_operand.vmem [shape: bf16[128,32], index: 9, kind: input, shape index: {}]   ;;  %s5155_s10 = inlined_call_operand.vmem [shape: f32[1,32], index: 10, kind: input, shape index: {}]   ;;  %s5156_s11 = inlined_call_operand.vmem [shape: f32[1,32], index: 11, kind: input, shape index: {}]   ;;  %s5157_s12 = inlined_call_operand.vmem [shape: f32[1,32], index: 12, kind: input, shape index: {}]   ;;  %s5158_s13 = inlined_call_operand.vmem [shape: f32[1,32], index: 13, kind: input, shape index: {}]   ;;  %s5159_s14 = inlined_call_operand.vmem [shape: f32[1,32], index: 14, kind: input, shape index: {}]   ;;  %s5160_s15 = inlined_call_operand.hbm [shape: f32[16,32], index: 15, kind: output, shape index: {}]  }
   0x1   :  { %5164 = sst [smem:[#allocation8_spill]] %s5145_s0 }
   0x2   :  { %5165 = sst [smem:[#allocation9_spill]] %s5146_s1 }
   0x3   :  { %5166 = sst [smem:[#allocation10_spill]] %s5147_s2 }
   0x4   :  { %5167 = sst [smem:[#allocation11_spill]] %s5148_s3 }
   0x5   :  { %20 = vsyncpa [#allocation3], 0 }
   0x6   :  { %22 = vsyncpa [#allocation3 + $0x1], 0  ;;  %s4482_s18 = smov 0   ;;  %s4484_s19 = smov 0  }
   0x7   :  { %s4486_s20 = smov 0   ;;  %s4488_s21 = smov 0  }
   0x8 LB: > { %5168 = sst [smem:[#allocation5_spill]] %s4393_s20  ;;  %s4503_s22 = sadd.s32 4294967295, %s4397_s21   ;;  %s4397_s21 = sphi %s4488_s21, %s5177_s21   ;;  %s4393_s20 = sphi %s4486_s20, %s5179_s20   ;;  %s4389_s19 = sphi %s4484_s19, %s5181_s19   ;;  %s4385_s18 = sphi %s4482_s18, %s5180_s18  }
   0x9   : > { %s3488_s23 = sadd.s32 4294967294, %s4397_s21   ;;  %s4507_s24 = sadd.s32 1, %s4397_s21  }
   0xa   : > { %5169 = sst [smem:[#allocation6_spill]] %s4507_s24  ;;  %s360_s25 = sadd.s32 1, %s4393_s20 }
   0xb   : > { %s357_s26 = ssub.s32 %s4397_s21, %s4507_s24  ;;  %p370_p0 = scmp.ne.s32.totalorder %s4393_s20, %s4389_s19 }
   0xc   : > { %p358_p1 = scmp.eq.s32.totalorder %s357_s26, 0  ;;  %p371_p2 = scmp.eq.s32.totalorder %s4503_s22, 1 }
   0xd   : > { %p376_p3 = scmp.ne.s32.totalorder %s4389_s19, %s4385_s18  ;;  %p377_p4 = scmp.eq.s32.totalorder %s3488_s23, 1 }
   0xe   : > { %s4518_s27 = scalar_select %p358_p1, %s4393_s20, %s360_s25  }
   0xf   : > { %p4520_p5 = por %p371_p2, %p370_p0  ;;  %p4524_p6 = por %p377_p4, %p376_p3 }
  0x10   : > { %5170 = sst [smem:[#allocation7_spill]] %s4518_s27  ;;  %p3491_p7 = scmp.ge.s32.totalorder %s4397_s21, 1 }
  0x11   : > { %p448_p8 = scmp.lt.s32.totalorder %s4397_s21, 3 }
  0x13   : > { %p449_p9 = pnand %p3491_p7, %p448_p8 }
  0x14   : > { %s5173_s2 = sld [smem:[#allocation10_spill]] (!%p449_p9)  ;;  %p499_p10 = scmp.lt.s32.totalorder (!%p449_p9), %s4503_s22, 1 }
  0x15   : > { %452 = sbr.rel (%p449_p9) target bundleno = 8394 (0x20ca), region = 80  ;;  %s5174_s3 = sld [smem:[#allocation11_spill]] (!%p449_p9) }
  0x16   : > { %s5175_s0 = sld [smem:[#allocation8_spill]] (!%p449_p9)  ;;  %s496_s24 = sand.u32 (!%p449_p9), 1, %s4389_s19  }
  0x17   : > { %s5176_s1 = sld [smem:[#allocation9_spill]] (!%p449_p9)  ;;  %s4401_s16 = smov (!%p449_p9), [#allocation2]  }
  0x18   : > { %s4341_s17 = sshll.u32 (!%p449_p9), %s4401_s16, 4  ;;  %s4342_s17 = int_to_ptr.vmem [resolvable:$false] %s4341_s17 }
  0x1a   : > { %v4241_v0 = vld [vmem:[%s5173_s2 + $0x8] sm:$0xff]   ;;  %v4399_v1 = vmov 0.0   ;;  %v4242_v2 = vld [vmem:[%s5173_s2] sm:$0xff]   ;;  %vm4400_vm0 = vmmov 0   ;;  %s4545_s25 = scalar_select %p499_p10, %s4503_s22, 1  ;;  %vm527_vm1 = vcmask 261120  }
  0x1b   : > { %3836 = vmatprep.subr.bf16.mxu0 %v4399_v1  ;;  %3860 = vmatprep.subr.bf16.mxu1 %v4399_v1  ;;  %v4243_v3 = vld [vmem:[%s5174_s3 + $0x8] sm:$0xff]   ;;  %v4244_v6 = vld [vmem:[%s5174_s3] sm:$0xff]   ;;  %vm686_vm2 = vcmask 31744   ;;  %vm735_vm3 = vcmask 64512   ;;  %vm751_vm4 = vcmask 1043456   ;;  %v4248_v39 = vld [vmem:[%s5173_s2 + $0x18] sm:$0xff]  }
  0x1c   : > { %3837 = vmatpush3.bf16.msra.mxu0 %v4241_v0  ;;  %3840 = vmatprep.mubr.msk.bf16.mxu0 %vm4400_vm0, %v4399_v1  ;;  %s3493_s26 = sshll.u32 %s4545_s25, 3  ;;  %v4245_v18 = vld [vmem:[%s5149_s4 + $0x8] sm:$0xff]   ;;  %v4246_v19 = vld [vmem:[%s5149_s4] sm:$0xff]   ;;  %v4250_v40 = vld [vmem:[%s5173_s2 + $0x10] sm:$0xff]   ;;  %vm1083_vm5 = vcmask 1041408  }
  0x1d   : > { %3838 = vmatprep.subr.bf16.mxu0 %v4399_v1  ;;  %3862 = vmatprep.mubr.msk.bf16.mxu1 %vm4400_vm0, %v4399_v1  ;;  %s4556_s27 = scalar_lea.vmem %s5175_s0, %s3493_s26  ;;  %s4597_s20 = scalar_lea.vmem %s5176_s1, %s3493_s26  ;;  %v4247_v44 = vld [vmem:[%s5174_s3 + $0x18] sm:$0xff]   ;;  %v4249_v46 = vld [vmem:[%s5174_s3 + $0x10] sm:$0xff]  }
  0x1e   : > { %v508_v4 = vld [vmem:[%s4556_s27] sm:$0xff]  ;;  %v4251_v62 = vld [vmem:[%s5149_s4 + $0x18] sm:$0xff]   ;;  %v4252_v63 = vld [vmem:[%s5149_s4 + $0x10] sm:$0xff]  }
  0x1f   : > { %v4560_v5 = vpack.c.bf16 %v508_v4, %v508_v4  ;;  %v4600_v21 = vld [vmem:[%s4597_s20] sm:$0xff] }
  0x20   : > { %3839 = vmatpush3.bf16.msra.mxu0 %v4242_v2 }
  0x21   : > { %3844 = vmatprep.subr.bf16.mxu0 %v4399_v1 }
  0x23   : > { %3841 = vmatmul.mubr.msk.bf16.vlgmr.msra.gmra.mxu0 %vm527_vm1, %v4560_v5 }
  0x24   : > { %3845 = vmatpush3.bf16.msra.mxu0 %v4243_v3  ;;  %3848 = vmatprep.mubr.msk.bf16.mxu0 %vm4400_vm0, %v4399_v1 }
  0x25   : > { %3846 = vmatprep.subr.bf16.mxu0 %v4399_v1 }
  0x28   : > { %3847 = vmatpush3.bf16.msra.mxu0 %v4244_v6 }
  0x29   : > { %3852 = vmatprep.subr.bf16.mxu0 %v4399_v1 }
  0x2b   : > { %3849 = vmatmul.mubr.msk.bf16.vlgmr.msra.gmra.mxu0 %vm527_vm1, %v4560_v5 }
  0x2c   : > { %3856 = vmatprep.mubr.msk.bf16.mxu0 %vm4400_vm0, %v4399_v1  ;;  %3853 = vmatpush3.bf16.msra.mxu0 %v4245_v18 }
  0x2d   : > { %3854 = vmatprep.subr.bf16.mxu0 %v4399_v1 }
  0x30   : > { %3855 = vmatpush3.bf16.msra.mxu0 %v4246_v19 }
  0x31   : > { %3866 = vmatprep.subr.bf16.mxu0 %v4399_v1 }
  0x33   : > { %3857 = vmatmul.mubr.msk.bf16.vlgmr.msra.gmra.mxu0 %vm527_vm1, %v4560_v5 }
  0x34   : > { %3868 = vmatprep.mubr.msk.bf16.mxu0 %vm4400_vm0, %v4399_v1 }
  0xe3   : > { %v565_v7 = vpop.f32.mrf.mxu0 }
  0xe4   : > { %v683_v17 = vpack.c.bf16 %v565_v7, %v565_v7 }
  0xe5   : > { %v3842_v8 = vpop.f32.mrf.mxu0 }
  0xe7   : > { %v568_v9 = vpop.f32.mrf.mxu0 }
  0xe9   : > { %v3843_v10 = vpop.f32.mrf.mxu0 }
  0xeb   : > { %v621_v11 = vpop.f32.mrf.mxu0 }
  0xec   : > { %v684_v12 = vpack.c.bf16 %v621_v11, %v621_v11 }
  0xed   : > { %v3850_v13 = vpop.f32.mrf.mxu0 }
  0xee   : > { %v691_v14 = vsel %vm686_vm2, %v684_v12, 0 }
  0xef   : > { %v624_v15 = vpop.f32.mrf.mxu0  ;;  %3861 = vmatpush3.bf16.xpose.msra.mxu1 %v691_v14 }
  0xf0   : > { %3872 = vmatprep.subr.bf16.mxu1 %v4399_v1 }
  0xf1   : > { %v3851_v16 = vpop.f32.mrf.mxu0 }
  0xf3   : > { %v677_v33 = vpop.f32.mrf.mxu0 }
  0xf4   : > { %v685_v34 = vpack.c.bf16 %v677_v33, %v677_v33  ;;  %v4255_v33 = vld [vmem:[%s5173_s2 + $0x28] sm:$0xff]  }
  0xf5   : > { %v3858_v35 = vpop.f32.mrf.mxu0 }
  0xf6   : > { %3863 = vmatmul.mubr.msk.bf16.vlgmr.msra.gmra.mxu1 %vm686_vm2, %v683_v17  ;;  %v753_v36 = vsel %vm751_vm4, %v685_v34, 0 }
  0xf7   : > { %3876 = vmatprep.mubr.msk.bf16.mxu1 %vm4400_vm0, %v4399_v1  ;;  %v680_v37 = vpop.f32.mrf.mxu0  ;;  %3867 = vmatpush3.bf16.msra.mxu0 %v753_v36 }
  0xf8   : > { %3880 = vmatprep.subr.bf16.mxu0 %v4399_v1  ;;  %3873 = vmatpush3.bf16.msra.mxu1 %v4248_v39  ;;  %v4256_v37 = vld [vmem:[%s5173_s2 + $0x20] sm:$0xff]  }
  0xf9   : > { %v3859_v38 = vpop.f32.mrf.mxu0  ;;  %3874 = vmatprep.subr.bf16.mxu1 %v4399_v1 }
  0xfc   : > { %3875 = vmatpush3.bf16.msra.mxu1 %v4250_v40 }
  0xfd   : > { %3888 = vmatprep.subr.bf16.mxu1 %v4399_v1 }
  0xff   : > { %3877 = vmatmul.mubr.msk.bf16.vlgmr.msra.gmra.mxu1 %vm527_vm1, %v4560_v5 }
 0x100   : > { %3892 = vmatprep.mubr.msk.bf16.mxu1 %vm4400_vm0, %v4399_v1  ;;  %3889 = vmatpush3.bf16.msra.mxu1 %v4251_v62 }
 0x101   : > { %3890 = vmatprep.subr.bf16.mxu1 %v4399_v1 }
 0x104   : > { %3891 = vmatpush3.bf16.msra.mxu1 %v4252_v63 }
 0x105   : > { %3902 = vmatprep.subr.bf16.mxu1 %v4399_v1 }
 0x107   : > { %3893 = vmatmul.mubr.msk.bf16.vlgmr.msra.gmra.mxu1 %vm527_vm1, %v4560_v5 }
 0x108   : > { %3904 = vmatprep.mubr.msk.bf16.mxu1 %vm4400_vm0, %v4399_v1 }
 0x1b6   : > { %v727_v20 = vpop.f32.mrf.mxu1 }
 0x1b7   : > { %v733_v22 = vmul.f32 0.5, %v727_v20  ;;  %v3529_v20 = vld [vmem:[%s5150_s5 + $0x2] sm:$0x3] }
 0x1b8   : > { %v3864_v23 = vpop.f32.mrf.mxu1 }
 0x1b9   : > { %v734_v24 = vadd.f32 %v733_v22, %v4600_v21  ;;  %v1085_v22 = vsel %vm1083_vm5, %v3529_v20, 0 }
 0x1ba   : > { %v730_v25 = vpop.f32.mrf.mxu1 }
 0x1bb   : > { %v736_v26 = vsel %vm735_vm3, %v734_v24, -inf  ;;  %v796_v25 = vld [vmem:[%s5150_s5] sm:$0x3] }
 0x1bc   : > { %737 = vmax.xlane.f32.xlu0 %v736_v26  ;;  %v3865_v27 = vpop.f32.mrf.mxu1 }
 0x1bf   : > { %v848_v47 = vpop.f32.mrf.mxu1 }
 0x1c0   : > { %v968_v61 = vpack.c.bf16 %v848_v47, %v848_v47 }
 0x1c1   : > { %v3878_v48 = vpop.f32.mrf.mxu1 }
 0x1c3   : > { %v851_v49 = vpop.f32.mrf.mxu1 }
 0x1c5   : > { %v3879_v50 = vpop.f32.mrf.mxu1 }
 0x1c7   : > { %v962_v14 = vpop.f32.mrf.mxu1 }
 0x1c8   : > { %v970_v15 = vpack.c.bf16 %v962_v14, %v962_v14 }
 0x1c9   : > { %v3894_v16 = vpop.f32.mrf.mxu1 }
 0x1ca   : > { %v1035_v17 = vsel %vm751_vm4, %v970_v15, 0  ;;  %v3555_v16 = vld [vmem:[%s5150_s5 + $0x4] sm:$0x3] }
 0x1cb   : > { %v965_v18 = vpop.f32.mrf.mxu1  ;;  %3903 = vmatpush3.bf16.msra.mxu1 %v1035_v17  ;;  %v1460_v17 = vsel %vm1083_vm5, %v3555_v16, 0  ;;  %v4265_v16 = vld [vmem:[%s5174_s3 + $0x48] sm:$0xff]  }
 0x1cc   : > { %3914 = vmatprep.subr.bf16.mxu1 %v4399_v1 }
 0x1cd   : > { %v3895_v19 = vpop.f32.mrf.mxu1 }
 0x245   : > { %v738_v28 = vpop.xlane.xlu0 %737 }
 0x246   : > { %v739_v29 = vsub.f32 %v734_v24, %v738_v28  ;;  %v1131_v28 = vsel %vm1083_vm5, %v796_v25, 0 }
 0x248   : > { %v740_v30 = vmul.f32 1.442695, %v739_v29  ;;  %v4253_v29 = vld [vmem:[%s5174_s3 + $0x28] sm:$0xff]  }
 0x24a   : > { %4299 = vpow2.f32 %v740_v30 }
 0x257   : > { %v4300_v31 = vpop.eup %4299 }
 0x258   : > { %v742_v32 = vsel %vm735_vm3, %v4300_v31, 0.0 }
 0x259   : > { %743 = vadd.xlane.f32.xlu0 %v742_v32 }
 0x2e2   : > { %v744_v41 = vpop.xlane.xlu0 %743 }
 0x2e3   : > { %4301 = vrcp.f32 %v744_v41 }
 0x2f0   : > { %v4302_v42 = vpop.eup %4301 }
 0x2f1   : > { %v746_v43 = vmul.f32 %v4302_v42, %v4300_v31  ;;  %v4254_v31 = vld [vmem:[%s5174_s3 + $0x20] sm:$0xff]  }
 0x2f3   : > { %v747_v45 = vpack.c.bf16 %v746_v43, %v746_v43 }
 0x2f5   : > { %3869 = vmatmul.mubr.msk.bf16.vlgmr.msra.gmra.mxu0 %vm735_vm3, %v747_v45 }
 0x2f6   : > { %3881 = vmatpush3.bf16.msra.mxu0 %v4247_v44  ;;  %3884 = vmatprep.mubr.msk.bf16.mxu0 %vm4400_vm0, %v4399_v1 }
 0x2f7   : > { %3882 = vmatprep.subr.bf16.mxu0 %v4399_v1 }
 0x2fa   : > { %3883 = vmatpush3.bf16.msra.mxu0 %v4249_v46 }
 0x2fb   : > { %3896 = vmatprep.subr.bf16.mxu0 %v4399_v1 }
 0x2fd   : > { %3885 = vmatmul.mubr.msk.bf16.vlgmr.msra.gmra.mxu0 %vm527_vm1, %v4560_v5 }
 0x2fe   : > { %3898 = vmatprep.mubr.msk.bf16.mxu0 %vm4400_vm0, %v4399_v1 }
 0x3b5   : > { %v4634_v51 = vpop.f32.mrf.mxu0 }
 0x3b6   : > { %v795_v30 = vpack.c.bf16 %v4634_v51, %v4634_v51 }
 0x3b7   : > { %v3870_v52 = vpop.f32.mrf.mxu0 }
 0x3b9   : > { %v792_v53 = vpop.f32.mrf.mxu0 }
 0x3bb   : > { %v3871_v54 = vpop.f32.mrf.mxu0 }
 0x3bd   : > { %v905_v55 = vpop.f32.mrf.mxu0 }
 0x3be   : > { %v969_v56 = vpack.c.bf16 %v905_v55, %v905_v55 }
 0x3bf   : > { %v3886_v57 = vpop.f32.mrf.mxu0 }
 0x3c0   : > { %v975_v58 = vsel %vm686_vm2, %v969_v56, 0 }
 0x3c1   : > { %v908_v59 = vpop.f32.mrf.mxu0  ;;  %3897 = vmatpush3.bf16.xpose.msra.mxu0 %v975_v58  ;;  %v4257_v58 = vld [vmem:[%s5149_s4 + $0x28] sm:$0xff]  }
 0x3c2   : > { %3908 = vmatprep.subr.bf16.mxu0 %v4399_v1  ;;  %v4258_v59 = vld [vmem:[%s5149_s4 + $0x20] sm:$0xff]  }
 0x3c3   : > { %v3887_v60 = vpop.f32.mrf.mxu0 }
 0x3c8   : > { %3899 = vmatmul.mubr.msk.bf16.vlgmr.msra.gmra.mxu0 %vm686_vm2, %v968_v61 }
 0x3c9   : > { %3910 = vmatprep.mubr.msk.bf16.mxu0 %vm4400_vm0, %v4399_v1  ;;  %3909 = vmatpush3.bf16.msra.mxu0 %v1085_v22 }
 0x3ca   : > { %3920 = vmatprep.subr.bf16.mxu0 %v4399_v1 }
 0x488   : > { %v1011_v0 = vpop.f32.mrf.mxu0 }
 0x489   : > { %v1017_v2 = vmul.f32 0.5, %v1011_v0 }
 0x48a   : > { %v3900_v3 = vpop.f32.mrf.mxu0 }
 0x48b   : > { %v1018_v4 = vadd.f32 %v1017_v2, %v4600_v21 }
 0x48c   : > { %v1014_v6 = vpop.f32.mrf.mxu0 }
 0x48d   : > { %v1019_v7 = vsel %vm735_vm3, %v1018_v4, -inf }
 0x48e   : > { %1020 = vmax.xlane.f32.xlu1 %v1019_v7  ;;  %v3901_v8 = vpop.f32.mrf.mxu0 }
 0x517   : > { %v1021_v9 = vpop.xlane.xlu1 %1020 }
 0x518   : > { %v1022_v10 = vsub.f32 %v1018_v4, %v1021_v9 }
 0x51a   : > { %v1023_v11 = vmul.f32 1.442695, %v1022_v10 }
 0x51c   : > { %4303 = vpow2.f32 %v1023_v11 }
 0x529   : > { %v4304_v12 = vpop.eup %4303 }
 0x52a   : > { %v1025_v13 = vsel %vm735_vm3, %v4304_v12, 0.0 }
 0x52b   : > { %1026 = vadd.xlane.f32.xlu1 %v1025_v13 }
 0x5b4   : > { %v1027_v23 = vpop.xlane.xlu1 %1026 }
 0x5b5   : > { %4305 = vrcp.f32 %v1027_v23  ;;  %v4260_v23 = vld [vmem:[%s5173_s2 + $0x38] sm:$0xff]  }
 0x5c2   : > { %v4306_v24 = vpop.eup %4305 }
 0x5c3   : > { %v1029_v26 = vmul.f32 %v4306_v24, %v4304_v12  ;;  %v4262_v24 = vld [vmem:[%s5173_s2 + $0x30] sm:$0xff]  }
 0x5c5   : > { %v1030_v27 = vpack.c.bf16 %v1029_v26, %v1029_v26  ;;  %v4259_v26 = vld [vmem:[%s5174_s3 + $0x38] sm:$0xff]  }
 0x5c7   : > { %3905 = vmatmul.mubr.msk.bf16.vlgmr.msra.gmra.mxu1 %vm735_vm3, %v1030_v27 }
 0x5c8   : > { %3915 = vmatpush3.bf16.msra.mxu1 %v1131_v28  ;;  %3916 = vmatprep.mubr.msk.bf16.mxu1 %vm4400_vm0, %v4399_v1 }
 0x5c9   : > { %3928 = vmatprep.subr.bf16.mxu1 %v4399_v1 }
 0x5cf   : > { %3917 = vmatmul.mubr.msk.bf16.vlgmr.msra.gmra.mxu1 %vm686_vm2, %v795_v30  ;;  %v4261_v30 = vld [vmem:[%s5174_s3 + $0x30] sm:$0xff]  }
 0x5d0   : > { %3929 = vmatpush3.bf16.msra.mxu1 %v4253_v29  ;;  %3932 = vmatprep.mubr.msk.bf16.mxu1 %vm4400_vm0, %v4399_v1 }
 0x5d1   : > { %3930 = vmatprep.subr.bf16.mxu1 %v4399_v1 }
 0x5d4   : > { %3931 = vmatpush3.bf16.msra.mxu1 %v4254_v31 }
 0x5d5   : > { %3944 = vmatprep.subr.bf16.mxu1 %v4399_v1 }
 0x5d7   : > { %3933 = vmatmul.mubr.msk.bf16.vlgmr.msra.gmra.mxu1 %vm527_vm1, %v4560_v5 }
 0x5d8   : > { %3946 = vmatprep.mubr.msk.bf16.mxu1 %vm4400_vm0, %v4399_v1 }
 0x687   : > { %v1071_v32 = vpop.f32.mrf.mxu1 }
 0x688   : > { %v1077_v34 = vpack.c.bf16 %v1071_v32, %v1071_v32 }
 0x689   : > { %v3906_v35 = vpop.f32.mrf.mxu1 }
 0x68a   : > { %3911 = vmatmul.mubr.msk.bf16.vlgmr.msra.gmra.mxu0 %vm686_vm2, %v1077_v34 }
 0x68b   : > { %v1074_v36 = vpop.f32.mrf.mxu1  ;;  %3921 = vmatpush3.bf16.msra.mxu0 %v4255_v33  ;;  %3924 = vmatprep.mubr.msk.bf16.mxu0 %vm4400_vm0, %v4399_v1 }
 0x68c   : > { %3922 = vmatprep.subr.bf16.mxu0 %v4399_v1 }
 0x68d   : > { %v3907_v38 = vpop.f32.mrf.mxu1 }
 0x68f   : > { %v4698_v39 = vpop.f32.mrf.mxu1  ;;  %3923 = vmatpush3.bf16.msra.mxu0 %v4256_v37 }
 0x690   : > { %3936 = vmatprep.subr.bf16.mxu0 %v4399_v1 }
 0x691   : > { %v3918_v40 = vpop.f32.mrf.mxu1 }
 0x692   : > { %3925 = vmatmul.mubr.msk.bf16.vlgmr.msra.gmra.mxu0 %vm527_vm1, %v4560_v5 }
 0x693   : > { %v1170_v41 = vpop.f32.mrf.mxu1  ;;  %3940 = vmatprep.mubr.msk.bf16.mxu0 %vm4400_vm0, %v4399_v1  ;;  %3937 = vmatpush3.bf16.msra.mxu0 %v4257_v58 }
 0x694   : > { %3938 = vmatprep.subr.bf16.mxu0 %v4399_v1 }
 0x695   : > { %v3919_v42 = vpop.f32.mrf.mxu1 }
 0x697   : > { %v1281_v43 = vpop.f32.mrf.mxu1  ;;  %3939 = vmatpush3.bf16.msra.mxu0 %v4258_v59 }
 0x698   : > { %v1345_v44 = vpack.c.bf16 %v1281_v43, %v1281_v43  ;;  %3950 = vmatprep.subr.bf16.mxu0 %v4399_v1 }
 0x699   : > { %v3934_v45 = vpop.f32.mrf.mxu1 }
 0x69a   : > { %v1351_v46 = vsel %vm686_vm2, %v1345_v44, 0  ;;  %3941 = vmatmul.mubr.msk.bf16.vlgmr.msra.gmra.mxu0 %vm527_vm1, %v4560_v5 }
 0x69b   : > { %v1284_v47 = vpop.f32.mrf.mxu1  ;;  %3945 = vmatpush3.bf16.xpose.msra.mxu1 %v1351_v46  ;;  %3952 = vmatprep.mubr.msk.bf16.mxu0 %vm4400_vm0, %v4399_v1 }
 0x69c   : > { %3956 = vmatprep.subr.bf16.mxu1 %v4399_v1 }
 0x69d   : > { %v3935_v48 = vpop.f32.mrf.mxu1 }
 0x74a   : > { %v4707_v49 = vpop.f32.mrf.mxu0 }
 0x74b   : > { %v1168_v36 = vadd.f32 %v4698_v39, %v4707_v49  ;;  %v4263_v39 = vld [vmem:[%s5149_s4 + $0x38] sm:$0xff]   ;;  %v4264_v49 = vld [vmem:[%s5149_s4 + $0x30] sm:$0xff]  }
 0x74c   : > { %v3912_v50 = vpop.f32.mrf.mxu0 }
 0x74e   : > { %v1124_v51 = vpop.f32.mrf.mxu0 }
 0x750   : > { %v3913_v52 = vpop.f32.mrf.mxu0 }
 0x752   : > { %v1224_v53 = vpop.f32.mrf.mxu0 }
 0x753   : > { %v1344_v54 = vpack.c.bf16 %v1224_v53, %v1224_v53 }
 0x754   : > { %v3926_v55 = vpop.f32.mrf.mxu0 }
 0x755   : > { %3947 = vmatmul.mubr.msk.bf16.vlgmr.msra.gmra.mxu1 %vm686_vm2, %v1344_v54 }
 0x756   : > { %v1227_v56 = vpop.f32.mrf.mxu0  ;;  %3958 = vmatprep.mubr.msk.bf16.mxu1 %vm4400_vm0, %v4399_v1  ;;  %3957 = vmatpush3.bf16.msra.mxu1 %v1460_v17 }
 0x757   : > { %3970 = vmatprep.subr.bf16.mxu1 %v4399_v1 }
 0x758   : > { %v3927_v57 = vpop.f32.mrf.mxu0 }
 0x75a   : > { %v1338_v10 = vpop.f32.mrf.mxu0 }
 0x75b   : > { %v1346_v11 = vpack.c.bf16 %v1338_v10, %v1338_v10 }
 0x75c   : > { %v3942_v12 = vpop.f32.mrf.mxu0 }
 0x75d   : > { %v1411_v13 = vsel %vm751_vm4, %v1346_v11, 0 }
 0x75e   : > { %v1341_v14 = vpop.f32.mrf.mxu0  ;;  %3951 = vmatpush3.bf16.msra.mxu0 %v1411_v13  ;;  %v4266_v13 = vld [vmem:[%s5173_s2 + $0x48] sm:$0xff]  }
 0x75f   : > { %3962 = vmatprep.subr.bf16.mxu0 %v4399_v1  ;;  %v4268_v14 = vld [vmem:[%s5173_s2 + $0x40] sm:$0xff]  }
 0x760   : > { %v3943_v15 = vpop.f32.mrf.mxu0 }
 0x815   : > { %v1387_v60 = vpop.f32.mrf.mxu1 }
 0x816   : > { %v1393_v61 = vmul.f32 0.5, %v1387_v60 }
 0x817   : > { %v3948_v62 = vpop.f32.mrf.mxu1 }
 0x818   : > { %v1394_v63 = vadd.f32 %v1393_v61, %v4600_v21 }
 0x819   : > { %v1390_v0 = vpop.f32.mrf.mxu1 }
 0x81a   : > { %v1395_v2 = vsel %vm735_vm3, %v1394_v63, -inf }
 0x81b   : > { %1396 = vmax.xlane.f32.xlu0 %v1395_v2  ;;  %v3949_v3 = vpop.f32.mrf.mxu1 }
 0x8a4   : > { %v1397_v4 = vpop.xlane.xlu0 %1396 }
 0x8a5   : > { %v1398_v6 = vsub.f32 %v1394_v63, %v1397_v4 }
 0x8a7   : > { %v1399_v7 = vmul.f32 1.442695, %v1398_v6 }
 0x8a9   : > { %4307 = vpow2.f32 %v1399_v7  ;;  %v3580_v7 = vld [vmem:[%s5150_s5 + $0x6] sm:$0x3] }
 0x8b6   : > { %v4308_v8 = vpop.eup %4307 }
 0x8b7   : > { %v1401_v9 = vsel %vm735_vm3, %v4308_v8, 0.0 }
 0x8b8   : > { %1402 = vadd.xlane.f32.xlu1 %v1401_v9 }
 0x941   : > { %v1403_v18 = vpop.xlane.xlu1 %1402 }
 0x942   : > { %4309 = vrcp.f32 %v1403_v18 }
 0x94f   : > { %v4310_v19 = vpop.eup %4309 }
 0x950   : > { %v1405_v20 = vmul.f32 %v4310_v19, %v4308_v8  ;;  %v1790_v8 = vsel %vm1083_vm5, %v3580_v7, 0 }
 0x952   : > { %v1406_v22 = vpack.c.bf16 %v1405_v20, %v1405_v20  ;;  %v4267_v20 = vld [vmem:[%s5174_s3 + $0x40] sm:$0xff]  }
 0x954   : > { %3953 = vmatmul.mubr.msk.bf16.vlgmr.msra.gmra.mxu0 %vm735_vm3, %v1406_v22 }
 0x955   : > { %3966 = vmatprep.mubr.msk.bf16.mxu0 %vm4400_vm0, %v4399_v1  ;;  %3963 = vmatpush3.bf16.msra.mxu0 %v4260_v23 }
 0x956   : > { %3964 = vmatprep.subr.bf16.mxu0 %v4399_v1 }
 0x959   : > { %3965 = vmatpush3.bf16.msra.mxu0 %v4262_v24 }
 0x95a   : > { %3978 = vmatprep.subr.bf16.mxu0 %v4399_v1 }
 0x95c   : > { %3967 = vmatmul.mubr.msk.bf16.vlgmr.msra.gmra.mxu0 %vm527_vm1, %v4560_v5 }
 0x95d   : > { %3982 = vmatprep.mubr.msk.bf16.mxu0 %vm4400_vm0, %v4399_v1  ;;  %3979 = vmatpush3.bf16.msra.mxu0 %v4263_v39 }
 0x95e   : > { %3980 = vmatprep.subr.bf16.mxu0 %v4399_v1 }
 0x961   : > { %3981 = vmatpush3.bf16.msra.mxu0 %v4264_v49 }
 0x962   : > { %3992 = vmatprep.subr.bf16.mxu0 %v4399_v1 }
 0x964   : > { %3983 = vmatmul.mubr.msk.bf16.vlgmr.msra.gmra.mxu0 %vm527_vm1, %v4560_v5 }
 0x965   : > { %3994 = vmatprep.mubr.msk.bf16.mxu0 %vm4400_vm0, %v4399_v1 }
 0xa14   : > { %v1447_v25 = vpop.f32.mrf.mxu0 }
 0xa15   : > { %v1453_v27 = vpack.c.bf16 %v1447_v25, %v1447_v25 }
 0xa16   : > { %v3954_v28 = vpop.f32.mrf.mxu0 }
 0xa17   : > { %3959 = vmatmul.mubr.msk.bf16.vlgmr.msra.gmra.mxu1 %vm686_vm2, %v1453_v27 }
 0xa18   : > { %v1450_v29 = vpop.f32.mrf.mxu0  ;;  %3971 = vmatpush3.bf16.msra.mxu1 %v4259_v26  ;;  %3974 = vmatprep.mubr.msk.bf16.mxu1 %vm4400_vm0, %v4399_v1 }
 0xa19   : > { %3972 = vmatprep.subr.bf16.mxu1 %v4399_v1 }
 0xa1a   : > { %v3955_v31 = vpop.f32.mrf.mxu0 }
 0xa1c   : > { %3973 = vmatpush3.bf16.msra.mxu1 %v4261_v30  ;;  %v1554_v32 = vpop.f32.mrf.mxu0 }
 0xa1d   : > { %3986 = vmatprep.subr.bf16.mxu1 %v4399_v1  ;;  %v1674_v50 = vpack.c.bf16 %v1554_v32, %v1554_v32 }
 0xa1e   : > { %v3968_v33 = vpop.f32.mrf.mxu0 }
 0xa1f   : > { %3975 = vmatmul.mubr.msk.bf16.vlgmr.msra.gmra.mxu1 %vm527_vm1, %v4560_v5 }
 0xa20   : > { %3988 = vmatprep.mubr.msk.bf16.mxu1 %vm4400_vm0, %v4399_v1  ;;  %v1557_v34 = vpop.f32.mrf.mxu0 }
 0xa22   : > { %v3969_v35 = vpop.f32.mrf.mxu0 }
 0xa24   : > { %v1668_v63 = vpop.f32.mrf.mxu0 }
 0xa25   : > { %v1676_v0 = vpack.c.bf16 %v1668_v63, %v1668_v63 }
 0xa26   : > { %v3984_v2 = vpop.f32.mrf.mxu0 }
 0xa27   : > { %v1741_v3 = vsel %vm751_vm4, %v1676_v0, 0  ;;  %v4272_v2 = vld [vmem:[%s5173_s2 + $0x58] sm:$0xff]  }
 0xa28   : > { %v1671_v4 = vpop.f32.mrf.mxu0  ;;  %3993 = vmatpush3.bf16.msra.mxu0 %v1741_v3  ;;  %v4274_v3 = vld [vmem:[%s5173_s2 + $0x50] sm:$0xff]  }
 0xa29   : > { %4004 = vmatprep.subr.bf16.mxu0 %v4399_v1 }
 0xa2a   : > { %v3985_v6 = vpop.f32.mrf.mxu0 }
 0xa2b   : > { %v4271_v6 = vld [vmem:[%s5174_s3 + $0x58] sm:$0xff]  }
 0xad7   : > { %v1496_v37 = vpop.f32.mrf.mxu1 }
 0xad8   : > { %v4766_v38 = vadd.f32 %v1496_v37, %v1168_v36 }
 0xad9   : > { %v3960_v40 = vpop.f32.mrf.mxu1 }
 0xadb   : > { %v1499_v41 = vpop.f32.mrf.mxu1 }
 0xadc   : > { %v4270_v41 = vld [vmem:[%s5149_s4 + $0x40] sm:$0xff]  }
 0xadd   : > { %v3961_v42 = vpop.f32.mrf.mxu1 }
 0xadf   : > { %v1611_v43 = vpop.f32.mrf.mxu1 }
 0xae0   : > { %v1675_v44 = vpack.c.bf16 %v1611_v43, %v1611_v43 }
 0xae1   : > { %v3976_v45 = vpop.f32.mrf.mxu1 }
 0xae2   : > { %v1681_v46 = vsel %vm686_vm2, %v1675_v44, 0 }
 0xae3   : > { %v1614_v47 = vpop.f32.mrf.mxu1  ;;  %3987 = vmatpush3.bf16.xpose.msra.mxu1 %v1681_v46 }
 0xae4   : > { %3998 = vmatprep.subr.bf16.mxu1 %v4399_v1 }
 0xae5   : > { %v3977_v48 = vpop.f32.mrf.mxu1 }
 0xaea   : > { %3989 = vmatmul.mubr.msk.bf16.vlgmr.msra.gmra.mxu1 %vm686_vm2, %v1674_v50 }
 0xaeb   : > { %4000 = vmatprep.mubr.msk.bf16.mxu1 %vm4400_vm0, %v4399_v1  ;;  %3999 = vmatpush3.bf16.msra.mxu1 %v1790_v8 }
 0xaec   : > { %4012 = vmatprep.subr.bf16.mxu1 %v4399_v1 }
 0xbaa   : > { %v1717_v51 = vpop.f32.mrf.mxu1 }
 0xbab   : > { %v1723_v52 = vmul.f32 0.5, %v1717_v51 }
 0xbac   : > { %v3990_v53 = vpop.f32.mrf.mxu1 }
 0xbad   : > { %v1724_v54 = vadd.f32 %v1723_v52, %v4600_v21 }
 0xbae   : > { %v1720_v55 = vpop.f32.mrf.mxu1 }
 0xbaf   : > { %v1725_v56 = vsel %vm735_vm3, %v1724_v54, -inf }
 0xbb0   : > { %1726 = vmax.xlane.f32.xlu0 %v1725_v56  ;;  %v3991_v57 = vpop.f32.mrf.mxu1 }
 0xc39   : > { %v1727_v58 = vpop.xlane.xlu0 %1726 }
 0xc3a   : > { %v1728_v59 = vsub.f32 %v1724_v54, %v1727_v58 }
 0xc3c   : > { %v1729_v60 = vmul.f32 1.442695, %v1728_v59  ;;  %v3605_v59 = vld [vmem:[%s5150_s5 + $0x8] sm:$0x3] }
 0xc3e   : > { %4311 = vpow2.f32 %v1729_v60  ;;  %v2120_v60 = vsel %vm1083_vm5, %v3605_v59, 0 }
 0xc4b   : > { %v4312_v61 = vpop.eup %4311 }
 0xc4c   : > { %v1731_v62 = vsel %vm735_vm3, %v4312_v61, 0.0 }
 0xc4d   : > { %1732 = vadd.xlane.f32.xlu1 %v1731_v62 }
 0xcd6   : > { %v1733_v9 = vpop.xlane.xlu1 %1732 }
 0xcd7   : > { %4313 = vrcp.f32 %v1733_v9 }
 0xce4   : > { %v4314_v10 = vpop.eup %4313 }
 0xce5   : > { %v1735_v11 = vmul.f32 %v4314_v10, %v4312_v61  ;;  %v4273_v10 = vld [vmem:[%s5174_s3 + $0x50] sm:$0xff]  }
 0xce7   : > { %v1736_v12 = vpack.c.bf16 %v1735_v11, %v1735_v11 }
 0xce9   : > { %3995 = vmatmul.mubr.msk.bf16.vlgmr.msra.gmra.mxu0 %vm735_vm3, %v1736_v12 }
 0xcea   : > { %4008 = vmatprep.mubr.msk.bf16.mxu0 %vm4400_vm0, %v4399_v1  ;;  %4005 = vmatpush3.bf16.msra.mxu0 %v4266_v13 }
 0xceb   : > { %4006 = vmatprep.subr.bf16.mxu0 %v4399_v1 }
 0xcee   : > { %4007 = vmatpush3.bf16.msra.mxu0 %v4268_v14 }
 0xcef   : > { %4020 = vmatprep.subr.bf16.mxu0 %v4399_v1 }
 0xcf1   : > { %4009 = vmatmul.mubr.msk.bf16.vlgmr.msra.gmra.mxu0 %vm527_vm1, %v4560_v5 }
 0xcf2   : > { %4024 = vmatprep.mubr.msk.bf16.mxu0 %vm4400_vm0, %v4399_v1 }
 0xda9   : > { %v1777_v15 = vpop.f32.mrf.mxu0 }
 0xdaa   : > { %v1783_v17 = vpack.c.bf16 %v1777_v15, %v1777_v15 }
 0xdab   : > { %v3996_v18 = vpop.f32.mrf.mxu0 }
 0xdac   : > { %4001 = vmatmul.mubr.msk.bf16.vlgmr.msra.gmra.mxu1 %vm686_vm2, %v1783_v17 }
 0xdad   : > { %v1780_v19 = vpop.f32.mrf.mxu0  ;;  %4013 = vmatpush3.bf16.msra.mxu1 %v4265_v16  ;;  %4016 = vmatprep.mubr.msk.bf16.mxu1 %vm4400_vm0, %v4399_v1 }
 0xdae   : > { %4014 = vmatprep.subr.bf16.mxu1 %v4399_v1 }
 0xdaf   : > { %v3997_v22 = vpop.f32.mrf.mxu0 }
 0xdb1   : > { %4015 = vmatpush3.bf16.msra.mxu1 %v4267_v20  ;;  %v1884_v23 = vpop.f32.mrf.mxu0 }
 0xdb2   : > { %4028 = vmatprep.subr.bf16.mxu1 %v4399_v1  ;;  %v2004_v40 = vpack.c.bf16 %v1884_v23, %v1884_v23 }
 0xdb3   : > { %v4010_v24 = vpop.f32.mrf.mxu0 }
 0xdb4   : > { %4017 = vmatmul.mubr.msk.bf16.vlgmr.msra.gmra.mxu1 %vm527_vm1, %v4560_v5 }
 0xdb5   : > { %4030 = vmatprep.mubr.msk.bf16.mxu1 %vm4400_vm0, %v4399_v1  ;;  %v1887_v25 = vpop.f32.mrf.mxu0 }
 0xdb7   : > { %v4011_v26 = vpop.f32.mrf.mxu0 }
 0xe6c   : > { %v1826_v27 = vpop.f32.mrf.mxu1 }
 0xe6d   : > { %v4826_v28 = vadd.f32 %v1826_v27, %v4766_v38  ;;  %v4269_v38 = vld [vmem:[%s5149_s4 + $0x48] sm:$0xff]  }
 0xe6e   : > { %v4002_v29 = vpop.f32.mrf.mxu1  ;;  %4021 = vmatpush3.bf16.msra.mxu0 %v4269_v38 }
 0xe6f   : > { %4022 = vmatprep.subr.bf16.mxu0 %v4399_v1 }
 0xe70   : > { %v1829_v30 = vpop.f32.mrf.mxu1 }
 0xe71   : > { %v4276_v30 = vld [vmem:[%s5149_s4 + $0x50] sm:$0xff]  }
 0xe72   : > { %v4003_v31 = vpop.f32.mrf.mxu1  ;;  %4023 = vmatpush3.bf16.msra.mxu0 %v4270_v41 }
 0xe73   : > { %4034 = vmatprep.subr.bf16.mxu0 %v4399_v1 }
 0xe74   : > { %v1941_v32 = vpop.f32.mrf.mxu1 }
 0xe75   : > { %v2005_v33 = vpack.c.bf16 %v1941_v32, %v1941_v32  ;;  %4025 = vmatmul.mubr.msk.bf16.vlgmr.msra.gmra.mxu0 %vm527_vm1, %v4560_v5 }
 0xe76   : > { %v4018_v34 = vpop.f32.mrf.mxu1  ;;  %4036 = vmatprep.mubr.msk.bf16.mxu0 %vm4400_vm0, %v4399_v1 }
 0xe77   : > { %v2011_v35 = vsel %vm686_vm2, %v2005_v33, 0 }
 0xe78   : > { %v1944_v36 = vpop.f32.mrf.mxu1  ;;  %4029 = vmatpush3.bf16.xpose.msra.mxu1 %v2011_v35 }
 0xe79   : > { %4040 = vmatprep.subr.bf16.mxu1 %v4399_v1 }
 0xe7a   : > { %v4019_v37 = vpop.f32.mrf.mxu1 }
 0xe7f   : > { %4031 = vmatmul.mubr.msk.bf16.vlgmr.msra.gmra.mxu1 %vm686_vm2, %v2004_v40 }
 0xe80   : > { %4042 = vmatprep.mubr.msk.bf16.mxu1 %vm4400_vm0, %v4399_v1  ;;  %4041 = vmatpush3.bf16.msra.mxu1 %v2120_v60 }
 0xe81   : > { %4054 = vmatprep.subr.bf16.mxu1 %v4399_v1 }
 0xf35   : > { %v1998_v53 = vpop.f32.mrf.mxu0 }
 0xf36   : > { %v2006_v54 = vpack.c.bf16 %v1998_v53, %v1998_v53 }
 0xf37   : > { %v4026_v55 = vpop.f32.mrf.mxu0 }
 0xf38   : > { %v2071_v56 = vsel %vm751_vm4, %v2006_v54, 0  ;;  %v4278_v54 = vld [vmem:[%s5173_s2 + $0x68] sm:$0xff]   ;;  %v4280_v55 = vld [vmem:[%s5173_s2 + $0x60] sm:$0xff]  }
 0xf39   : > { %v2001_v57 = vpop.f32.mrf.mxu0  ;;  %4035 = vmatpush3.bf16.msra.mxu0 %v2071_v56 }
 0xf3a   : > { %4046 = vmatprep.subr.bf16.mxu0 %v4399_v1  ;;  %v4277_v57 = vld [vmem:[%s5174_s3 + $0x68] sm:$0xff]  }
 0xf3b   : > { %v4027_v58 = vpop.f32.mrf.mxu0 }
 0xf3f   : > { %v2047_v42 = vpop.f32.mrf.mxu1 }
 0xf40   : > { %v2053_v43 = vmul.f32 0.5, %v2047_v42 }
 0xf41   : > { %v4032_v44 = vpop.f32.mrf.mxu1 }
 0xf42   : > { %v2054_v45 = vadd.f32 %v2053_v43, %v4600_v21 }
 0xf43   : > { %v2050_v46 = vpop.f32.mrf.mxu1 }
 0xf44   : > { %v2055_v47 = vsel %vm735_vm3, %v2054_v45, -inf }
 0xf45   : > { %2056 = vmax.xlane.f32.xlu0 %v2055_v47  ;;  %v4033_v48 = vpop.f32.mrf.mxu1 }
 0xfce   : > { %v2057_v50 = vpop.xlane.xlu0 %2056 }
 0xfcf   : > { %v2058_v39 = vsub.f32 %v2054_v45, %v2057_v50  ;;  %v3630_v50 = vld [vmem:[%s5150_s5 + $0xa] sm:$0x3] }
 0xfd1   : > { %v2059_v49 = vmul.f32 1.442695, %v2058_v39  ;;  %v2450_v39 = vsel %vm1083_vm5, %v3630_v50, 0 }
 0xfd3   : > { %4315 = vpow2.f32 %v2059_v49 }
 0xfe0   : > { %v4316_v51 = vpop.eup %4315 }
 0xfe1   : > { %v2061_v52 = vsel %vm735_vm3, %v4316_v51, 0.0 }
 0xfe2   : > { %2062 = vadd.xlane.f32.xlu1 %v2061_v52 }
0x106b   : > { %v2063_v61 = vpop.xlane.xlu1 %2062 }
0x106c   : > { %4317 = vrcp.f32 %v2063_v61  ;;  %v4279_v61 = vld [vmem:[%s5174_s3 + $0x60] sm:$0xff]  }
0x1079   : > { %v4318_v62 = vpop.eup %4317 }
0x107a   : > { %v2065_v63 = vmul.f32 %v4318_v62, %v4316_v51 }
0x107c   : > { %v2066_v0 = vpack.c.bf16 %v2065_v63, %v2065_v63 }
0x107e   : > { %4037 = vmatmul.mubr.msk.bf16.vlgmr.msra.gmra.mxu0 %vm735_vm3, %v2066_v0 }
0x107f   : > { %4050 = vmatprep.mubr.msk.bf16.mxu0 %vm4400_vm0, %v4399_v1  ;;  %4047 = vmatpush3.bf16.msra.mxu0 %v4272_v2 }
0x1080   : > { %4048 = vmatprep.subr.bf16.mxu0 %v4399_v1 }
0x1083   : > { %4049 = vmatpush3.bf16.msra.mxu0 %v4274_v3 }
0x1084   : > { %4062 = vmatprep.subr.bf16.mxu0 %v4399_v1 }
0x1086   : > { %4051 = vmatmul.mubr.msk.bf16.vlgmr.msra.gmra.mxu0 %vm527_vm1, %v4560_v5 }
0x1087   : > { %4066 = vmatprep.mubr.msk.bf16.mxu0 %vm4400_vm0, %v4399_v1 }
0x113e   : > { %v2107_v4 = vpop.f32.mrf.mxu0 }
0x113f   : > { %v2113_v7 = vpack.c.bf16 %v2107_v4, %v2107_v4 }
0x1140   : > { %v4038_v8 = vpop.f32.mrf.mxu0 }
0x1141   : > { %4043 = vmatmul.mubr.msk.bf16.vlgmr.msra.gmra.mxu1 %vm686_vm2, %v2113_v7 }
0x1142   : > { %v2110_v9 = vpop.f32.mrf.mxu0  ;;  %4055 = vmatpush3.bf16.msra.mxu1 %v4271_v6  ;;  %4058 = vmatprep.mubr.msk.bf16.mxu1 %vm4400_vm0, %v4399_v1 }
0x1143   : > { %4056 = vmatprep.subr.bf16.mxu1 %v4399_v1 }
0x1144   : > { %v4039_v11 = vpop.f32.mrf.mxu0 }
0x1146   : > { %4057 = vmatpush3.bf16.msra.mxu1 %v4273_v10  ;;  %v2214_v12 = vpop.f32.mrf.mxu0 }
0x1147   : > { %4070 = vmatprep.subr.bf16.mxu1 %v4399_v1  ;;  %v2334_v29 = vpack.c.bf16 %v2214_v12, %v2214_v12 }
0x1148   : > { %v4052_v13 = vpop.f32.mrf.mxu0 }
0x1149   : > { %4059 = vmatmul.mubr.msk.bf16.vlgmr.msra.gmra.mxu1 %vm527_vm1, %v4560_v5 }
0x114a   : > { %4072 = vmatprep.mubr.msk.bf16.mxu1 %vm4400_vm0, %v4399_v1  ;;  %v2217_v14 = vpop.f32.mrf.mxu0 }
0x114c   : > { %v4053_v15 = vpop.f32.mrf.mxu0 }
0x1201   : > { %v2156_v16 = vpop.f32.mrf.mxu1 }
0x1202   : > { %v4886_v17 = vadd.f32 %v2156_v16, %v4826_v28  ;;  %v4275_v28 = vld [vmem:[%s5149_s4 + $0x58] sm:$0xff]  }
0x1203   : > { %v4044_v18 = vpop.f32.mrf.mxu1  ;;  %4063 = vmatpush3.bf16.msra.mxu0 %v4275_v28 }
0x1204   : > { %4064 = vmatprep.subr.bf16.mxu0 %v4399_v1  ;;  %v4282_v18 = vld [vmem:[%s5149_s4 + $0x60] sm:$0xff]  }
0x1205   : > { %v2159_v19 = vpop.f32.mrf.mxu1 }
0x1207   : > { %v4045_v20 = vpop.f32.mrf.mxu1  ;;  %4065 = vmatpush3.bf16.msra.mxu0 %v4276_v30 }
0x1208   : > { %4076 = vmatprep.subr.bf16.mxu0 %v4399_v1 }
0x1209   : > { %v2271_v22 = vpop.f32.mrf.mxu1 }
0x120a   : > { %v2335_v23 = vpack.c.bf16 %v2271_v22, %v2271_v22  ;;  %4067 = vmatmul.mubr.msk.bf16.vlgmr.msra.gmra.mxu0 %vm527_vm1, %v4560_v5 }
0x120b   : > { %v4060_v24 = vpop.f32.mrf.mxu1  ;;  %4078 = vmatprep.mubr.msk.bf16.mxu0 %vm4400_vm0, %v4399_v1 }
0x120c   : > { %v2341_v25 = vsel %vm686_vm2, %v2335_v23, 0  ;;  %v4966_v23 = vld [vmem:[%s4597_s20] sm:$0xff]  ;;  %s3701_s20 = sshll.u32 %s4503_s22, 7  ;;  %s4343_s22 = scalar_lea.vmem %s4342_s17, 256 }
0x120d   : > { %v2274_v26 = vpop.f32.mrf.mxu1  ;;  %4071 = vmatpush3.bf16.xpose.msra.mxu1 %v2341_v25 }
0x120e   : > { %4082 = vmatprep.subr.bf16.mxu1 %v4399_v1 }
0x120f   : > { %v4061_v27 = vpop.f32.mrf.mxu1 }
0x1214   : > { %4073 = vmatmul.mubr.msk.bf16.vlgmr.msra.gmra.mxu1 %vm686_vm2, %v2334_v29 }
0x1215   : > { %4084 = vmatprep.mubr.msk.bf16.mxu1 %vm4400_vm0, %v4399_v1  ;;  %4083 = vmatpush3.bf16.msra.mxu1 %v2450_v39 }
0x1216   : > { %4096 = vmatprep.subr.bf16.mxu1 %v4399_v1 }
0x12ca   : > { %v2328_v44 = vpop.f32.mrf.mxu0 }
0x12cb   : > { %v2336_v45 = vpack.c.bf16 %v2328_v44, %v2328_v44 }
0x12cc   : > { %v4068_v46 = vpop.f32.mrf.mxu0 }
0x12cd   : > { %v2401_v47 = vsel %vm751_vm4, %v2336_v45, 0  ;;  %v4284_v46 = vld [vmem:[%s5173_s2 + $0x78] sm:$0xff]  }
0x12ce   : > { %v2331_v48 = vpop.f32.mrf.mxu0  ;;  %4077 = vmatpush3.bf16.msra.mxu0 %v2401_v47  ;;  %v4286_v47 = vld [vmem:[%s5173_s2 + $0x70] sm:$0xff]   ;;  %s3415_s2 = scalar_lea.hbm %s5160_s15, %s3701_s20 }
0x12cf   : > { %4088 = vmatprep.subr.bf16.mxu0 %v4399_v1 }
0x12d4   : > { %v2377_v31 = vpop.f32.mrf.mxu1 }
0x12d5   : > { %v2383_v32 = vmul.f32 0.5, %v2377_v31 }
0x12d6   : > { %v4074_v33 = vpop.f32.mrf.mxu1 }
0x12d7   : > { %v2384_v34 = vadd.f32 %v2383_v32, %v4600_v21  ;;  %v4069_v21 = vpop.f32.mrf.mxu0 }
0x12d8   : > { %v2380_v35 = vpop.f32.mrf.mxu1  ;;  %v4283_v21 = vld [vmem:[%s5174_s3 + $0x78] sm:$0xff]  }
0x12d9   : > { %v2385_v36 = vsel %vm735_vm3, %v2384_v34, -inf }
0x12da   : > { %2386 = vmax.xlane.f32.xlu0 %v2385_v36  ;;  %v4075_v37 = vpop.f32.mrf.mxu1 }
0x1363   : > { %v2387_v40 = vpop.xlane.xlu0 %2386 }
0x1364   : > { %v2388_v38 = vsub.f32 %v2384_v34, %v2387_v40 }
0x1366   : > { %v2389_v41 = vmul.f32 1.442695, %v2388_v38  ;;  %v3655_v38 = vld [vmem:[%s5150_s5 + $0xc] sm:$0x3] }
0x1368   : > { %4319 = vpow2.f32 %v2389_v41  ;;  %v2780_v41 = vsel %vm1083_vm5, %v3655_v38, 0 }
0x1375   : > { %v4320_v42 = vpop.eup %4319 }
0x1376   : > { %v2391_v43 = vsel %vm735_vm3, %v4320_v42, 0.0 }
0x1377   : > { %2392 = vadd.xlane.f32.xlu1 %v2391_v43 }
0x1400   : > { %v2393_v49 = vpop.xlane.xlu1 %2392 }
0x1401   : > { %4321 = vrcp.f32 %v2393_v49 }
0x140e   : > { %v4322_v51 = vpop.eup %4321 }
0x140f   : > { %v2395_v52 = vmul.f32 %v4322_v51, %v4320_v42  ;;  %v4285_v51 = vld [vmem:[%s5174_s3 + $0x70] sm:$0xff]   ;;  %s3404_s3 = scalar_lea.sflag [#allocation3], %s496_s24 }
0x1411   : > { %v2396_v53 = vpack.c.bf16 %v2395_v52, %v2395_v52 }
0x1413   : > { %4079 = vmatmul.mubr.msk.bf16.vlgmr.msra.gmra.mxu0 %vm735_vm3, %v2396_v53 }
0x1414   : > { %4092 = vmatprep.mubr.msk.bf16.mxu0 %vm4400_vm0, %v4399_v1  ;;  %4089 = vmatpush3.bf16.msra.mxu0 %v4278_v54 }
0x1415   : > { %4090 = vmatprep.subr.bf16.mxu0 %v4399_v1 }
0x1418   : > { %4091 = vmatpush3.bf16.msra.mxu0 %v4280_v55 }
0x1419   : > { %4104 = vmatprep.subr.bf16.mxu0 %v4399_v1 }
0x141b   : > { %4093 = vmatmul.mubr.msk.bf16.vlgmr.msra.gmra.mxu0 %vm527_vm1, %v4560_v5 }
0x141c   : > { %4108 = vmatprep.mubr.msk.bf16.mxu0 %vm4400_vm0, %v4399_v1 }
0x14d3   : > { %v2437_v56 = vpop.f32.mrf.mxu0 }
0x14d4   : > { %v2443_v58 = vpack.c.bf16 %v2437_v56, %v2437_v56 }
0x14d5   : > { %v4080_v59 = vpop.f32.mrf.mxu0 }
0x14d6   : > { %4085 = vmatmul.mubr.msk.bf16.vlgmr.msra.gmra.mxu1 %vm686_vm2, %v2443_v58 }
0x14d7   : > { %v2440_v60 = vpop.f32.mrf.mxu0  ;;  %4097 = vmatpush3.bf16.msra.mxu1 %v4277_v57  ;;  %4100 = vmatprep.mubr.msk.bf16.mxu1 %vm4400_vm0, %v4399_v1 }
0x14d8   : > { %4098 = vmatprep.subr.bf16.mxu1 %v4399_v1 }
0x14d9   : > { %v4081_v62 = vpop.f32.mrf.mxu0 }
0x14db   : > { %4099 = vmatpush3.bf16.msra.mxu1 %v4279_v61  ;;  %v2544_v63 = vpop.f32.mrf.mxu0 }
0x14dc   : > { %4112 = vmatprep.subr.bf16.mxu1 %v4399_v1  ;;  %v2664_v16 = vpack.c.bf16 %v2544_v63, %v2544_v63 }
0x14dd   : > { %v4094_v0 = vpop.f32.mrf.mxu0 }
0x14de   : > { %4101 = vmatmul.mubr.msk.bf16.vlgmr.msra.gmra.mxu1 %vm527_vm1, %v4560_v5 }
0x14df   : > { %4114 = vmatprep.mubr.msk.bf16.mxu1 %vm4400_vm0, %v4399_v1  ;;  %v2547_v2 = vpop.f32.mrf.mxu0 }
0x14e1   : > { %v4095_v3 = vpop.f32.mrf.mxu0 }
0x1596   : > { %v2486_v4 = vpop.f32.mrf.mxu1 }
0x1597   : > { %v4946_v6 = vadd.f32 %v2486_v4, %v4886_v17  ;;  %v4281_v17 = vld [vmem:[%s5149_s4 + $0x68] sm:$0xff]  }
0x1598   : > { %v4086_v7 = vpop.f32.mrf.mxu1  ;;  %4105 = vmatpush3.bf16.msra.mxu0 %v4281_v17 }
0x1599   : > { %4106 = vmatprep.subr.bf16.mxu0 %v4399_v1 }
0x159a   : > { %v2489_v8 = vpop.f32.mrf.mxu1 }
0x159b   : > { %v4288_v8 = vld [vmem:[%s5149_s4 + $0x70] sm:$0xff]  }
0x159c   : > { %v4087_v9 = vpop.f32.mrf.mxu1  ;;  %4107 = vmatpush3.bf16.msra.mxu0 %v4282_v18 }
0x159d   : > { %4118 = vmatprep.subr.bf16.mxu0 %v4399_v1 }
0x159e   : > { %v2601_v10 = vpop.f32.mrf.mxu1 }
0x159f   : > { %v2665_v11 = vpack.c.bf16 %v2601_v10, %v2601_v10  ;;  %4109 = vmatmul.mubr.msk.bf16.vlgmr.msra.gmra.mxu0 %vm527_vm1, %v4560_v5 }
0x15a0   : > { %v4102_v12 = vpop.f32.mrf.mxu1  ;;  %4120 = vmatprep.mubr.msk.bf16.mxu0 %vm4400_vm0, %v4399_v1 }
0x15a1   : > { %v2671_v13 = vsel %vm686_vm2, %v2665_v11, 0 }
0x15a2   : > { %v2604_v14 = vpop.f32.mrf.mxu1  ;;  %4113 = vmatpush3.bf16.xpose.msra.mxu1 %v2671_v13 }
0x15a3   : > { %4124 = vmatprep.subr.bf16.mxu1 %v4399_v1 }
0x15a4   : > { %v4103_v15 = vpop.f32.mrf.mxu1 }
0x15a9   : > { %4115 = vmatmul.mubr.msk.bf16.vlgmr.msra.gmra.mxu1 %vm686_vm2, %v2664_v16 }
0x15aa   : > { %4126 = vmatprep.mubr.msk.bf16.mxu1 %vm4400_vm0, %v4399_v1  ;;  %4125 = vmatpush3.bf16.msra.mxu1 %v2780_v41 }
0x15ab   : > { %4138 = vmatprep.subr.bf16.mxu1 %v4399_v1 }
0x165f   : > { %v2658_v33 = vpop.f32.mrf.mxu0 }
0x1660   : > { %v2666_v34 = vpack.c.bf16 %v2658_v33, %v2658_v33 }
0x1661   : > { %v4110_v35 = vpop.f32.mrf.mxu0 }
0x1662   : > { %v2731_v36 = vsel %vm751_vm4, %v2666_v34, 0 }
0x1663   : > { %v2661_v37 = vpop.f32.mrf.mxu0  ;;  %4119 = vmatpush3.bf16.msra.mxu0 %v2731_v36 }
0x1664   : > { %4130 = vmatprep.subr.bf16.mxu0 %v4399_v1 }
0x1665   : > { %v4111_v40 = vpop.f32.mrf.mxu0 }
0x1669   : > { %v2707_v19 = vpop.f32.mrf.mxu1 }
0x166a   : > { %v2713_v20 = vmul.f32 0.5, %v2707_v19 }
0x166b   : > { %v4116_v22 = vpop.f32.mrf.mxu1 }
0x166c   : > { %v2714_v24 = vadd.f32 %v4966_v23, %v2713_v20 }
0x166d   : > { %v2710_v25 = vpop.f32.mrf.mxu1 }
0x166e   : > { %v2715_v26 = vsel %vm735_vm3, %v2714_v24, -inf }
0x166f   : > { %2716 = vmax.xlane.f32.xlu0 %v2715_v26  ;;  %v4117_v27 = vpop.f32.mrf.mxu1 }
0x1670   : > { %v3680_v27 = vld [vmem:[%s5150_s5 + $0xe] sm:$0x3] }
0x16f8   : > { %v2717_v29 = vpop.xlane.xlu0 %2716 }
0x16f9   : > { %v2718_v28 = vsub.f32 %v2714_v24, %v2717_v29  ;;  %v3110_v29 = vsel %vm1083_vm5, %v3680_v27, 0 }
0x16fb   : > { %v2719_v30 = vmul.f32 1.442695, %v2718_v28 }
0x16fd   : > { %4323 = vpow2.f32 %v2719_v30 }
0x170a   : > { %v4324_v31 = vpop.eup %4323 }
0x170b   : > { %v2721_v32 = vsel %vm735_vm3, %v4324_v31, 0.0 }
0x170c   : > { %2722 = vadd.xlane.f32.xlu1 %v2721_v32 }
0x1795   : > { %v2723_v42 = vpop.xlane.xlu1 %2722 }
0x1796   : > { %4325 = vrcp.f32 %v2723_v42  ;;  %v3682_v42 = vld [vmem:[%s5151_s6] ss:$0 sm:$0xff] }
0x17a3   : > { %v4326_v43 = vpop.eup %4325 }
0x17a4   : > { %v2725_v44 = vmul.f32 %v4326_v43, %v4324_v31  ;;  %v4336_v43 = vld [vmem:[%s4556_s27] sm:$0xff]  ;;  %s3492_s27 = sshll.u32 %s496_s24, 3 }
0x17a5   : > { %s498_s25 = scalar_lea.vmem [#allocation2], %s3492_s27 }
0x17a6   : > { %v2726_v45 = vpack.c.bf16 %v2725_v44, %v2725_v44  ;;  %s3417_s26 = sshll.u32 %s498_s25, 4  ;;  %s3418_s26 = int_to_ptr.vmem [resolvable:$true] %s3417_s26 }
0x17a7   : > { %s4337_s30 = scalar_lea.vmem %s3418_s26, 128  ;;  %p4344_p0 = scmp.lt.s32.totalorder %s3418_s26, %s4342_s17 }
0x17a8   : > { %4121 = vmatmul.mubr.msk.bf16.vlgmr.msra.gmra.mxu0 %vm735_vm3, %v2726_v45  ;;  %p4338_p11 = scmp.ne.s32.totalorder %s3418_s26, %s4337_s30  ;;  %p4345_p1 = scmp.lt.s32.totalorder %s4343_s22, %s4337_s30 }
0x17a9   : > { %4134 = vmatprep.mubr.msk.bf16.mxu0 %vm4400_vm0, %v4399_v1  ;;  %4131 = vmatpush3.bf16.msra.mxu0 %v4284_v46 }
0x17aa   : > { %4132 = vmatprep.subr.bf16.mxu0 %v4399_v1  ;;  %p4339_p12 = pnand %p4338_p11, %p4520_p5  ;;  %p4346_p2 = por %p4345_p1, %p4344_p0 }
0x17ac   : > { %p4340_p13 = pneg %p4339_p12 }
0x17ad   : > { %4133 = vmatpush3.bf16.msra.mxu0 %v4286_v47 }
0x17ae   : > { %4146 = vmatprep.subr.bf16.mxu0 %v4399_v1  ;;  %p4347_p3 = pnand %p4346_p2, %p4340_p13 }
0x17b0   : > { %4135 = vmatmul.mubr.msk.bf16.vlgmr.msra.gmra.mxu0 %vm527_vm1, %v4560_v5 }
0x17b1   : > { %4150 = vmatprep.mubr.msk.bf16.mxu0 %vm4400_vm0, %v4399_v1 }
0x1868   : > { %v2767_v48 = vpop.f32.mrf.mxu0 }
0x1869   : > { %v2773_v50 = vpack.c.bf16 %v2767_v48, %v2767_v48 }
0x186a   : > { %v4122_v39 = vpop.f32.mrf.mxu0 }
0x186b   : > { %4127 = vmatmul.mubr.msk.bf16.vlgmr.msra.gmra.mxu1 %vm686_vm2, %v2773_v50 }
0x186c   : > { %v2770_v49 = vpop.f32.mrf.mxu0  ;;  %4139 = vmatpush3.bf16.msra.mxu1 %v4283_v21  ;;  %4142 = vmatprep.mubr.msk.bf16.mxu1 %vm4400_vm0, %v4399_v1 }
0x186d   : > { %4140 = vmatprep.subr.bf16.mxu1 %v4399_v1 }
0x186e   : > { %v4123_v52 = vpop.f32.mrf.mxu0 }
0x186f   : > { %v4289_v52 = vld [vmem:[%s5152_s7 + $0x8] sm:$0xff]  }
0x1870   : > { %4141 = vmatpush3.bf16.msra.mxu1 %v4285_v51  ;;  %v2874_v53 = vpop.f32.mrf.mxu0 }
0x1871   : > { %4154 = vmatprep.subr.bf16.mxu1 %v4399_v1  ;;  %v2994_v7 = vpack.c.bf16 %v2874_v53, %v2874_v53  ;;  %v4290_v53 = vld [vmem:[%s5152_s7] sm:$0xff]  }
0x1872   : > { %v4136_v54 = vpop.f32.mrf.mxu0 }
0x1873   : > { %4143 = vmatmul.mubr.msk.bf16.vlgmr.msra.gmra.mxu1 %vm527_vm1, %v4560_v5  ;;  %v4291_v54 = vld [vmem:[%s5154_s9 + $0x38] sm:$0xff]  }
0x1874   : > { %4156 = vmatprep.mubr.msk.bf16.mxu1 %vm4400_vm0, %v4399_v1  ;;  %v2877_v55 = vpop.f32.mrf.mxu0 }
0x1875   : > { %v4292_v55 = vld [vmem:[%s5154_s9 + $0x30] sm:$0xff]  }
0x1876   : > { %v4137_v56 = vpop.f32.mrf.mxu0 }
0x1877   : > { %v4293_v56 = vld [vmem:[%s5154_s9 + $0x28] sm:$0xff]  }
0x192b   : > { %v2816_v57 = vpop.f32.mrf.mxu1 }
0x192c   : > { %v5009_v58 = vadd.f32 %v2816_v57, %v4946_v6  ;;  %v4287_v6 = vld [vmem:[%s5149_s4 + $0x78] sm:$0xff]   ;;  %v4294_v57 = vld [vmem:[%s5154_s9 + $0x20] sm:$0xff]  }
0x192d   : > { %v4128_v59 = vpop.f32.mrf.mxu1  ;;  %4147 = vmatpush3.bf16.msra.mxu0 %v4287_v6 }
0x192e   : > { %4148 = vmatprep.subr.bf16.mxu0 %v4399_v1  ;;  %v4296_v59 = vld [vmem:[%s5154_s9 + $0x10] sm:$0xff]  }
0x192f   : > { %v2819_v60 = vpop.f32.mrf.mxu1 }
0x1931   : > { %v4129_v61 = vpop.f32.mrf.mxu1  ;;  %4149 = vmatpush3.bf16.msra.mxu0 %v4288_v8  ;;  %v4297_v8 = vld [vmem:[%s5154_s9 + $0x8] sm:$0xff]  }
0x1932   : > { %4160 = vmatprep.subr.bf16.mxu0 %v4399_v1 }
0x1933   : > { %v2931_v62 = vpop.f32.mrf.mxu1 }
0x1934   : > { %v2995_v63 = vpack.c.bf16 %v2931_v62, %v2931_v62  ;;  %4151 = vmatmul.mubr.msk.bf16.vlgmr.msra.gmra.mxu0 %vm527_vm1, %v4560_v5 }
0x1935   : > { %v4144_v0 = vpop.f32.mrf.mxu1  ;;  %4162 = vmatprep.mubr.msk.bf16.mxu0 %vm4400_vm0, %v4399_v1 }
0x1936   : > { %v3001_v2 = vsel %vm686_vm2, %v2995_v63, 0  ;;  %v3683_v0 = vld [vmem:[%s5156_s11] ss:$0 sm:$0xff] }
0x1937   : > { %v2934_v3 = vpop.f32.mrf.mxu1  ;;  %4155 = vmatpush3.bf16.xpose.msra.mxu1 %v3001_v2 }
0x1938   : > { %4166 = vmatprep.subr.bf16.mxu1 %v4399_v1  ;;  %v3684_v3 = vld [vmem:[%s5157_s12] ss:$0 sm:$0xff] }
0x1939   : > { %v4145_v4 = vpop.f32.mrf.mxu1 }
0x193e   : > { %4157 = vmatmul.mubr.msk.bf16.vlgmr.msra.gmra.mxu1 %vm686_vm2, %v2994_v7 }
0x193f   : > { %4168 = vmatprep.mubr.msk.bf16.mxu1 %vm4400_vm0, %v4399_v1  ;;  %4167 = vmatpush3.bf16.msra.mxu1 %v3110_v29 }
0x1940   : > { %4180 = vmatprep.subr.bf16.mxu1 %v4399_v1 }
0x19f4   : > { %v2988_v20 = vpop.f32.mrf.mxu0 }
0x19f5   : > { %v2996_v22 = vpack.c.bf16 %v2988_v20, %v2988_v20 }
0x19f6   : > { %v4152_v24 = vpop.f32.mrf.mxu0 }
0x19f7   : > { %v3061_v25 = vsel %vm751_vm4, %v2996_v22, 0 }
0x19f8   : > { %v2991_v26 = vpop.f32.mrf.mxu0  ;;  %4161 = vmatpush3.bf16.msra.mxu0 %v3061_v25 }
0x19f9   : > { %4172 = vmatprep.subr.bf16.mxu0 %v4399_v1 }
0x19fe   : > { %v3037_v9 = vpop.f32.mrf.mxu1 }
0x19ff   : > { %v3043_v10 = vmul.f32 0.5, %v3037_v9  ;;  %v4298_v9 = vld [vmem:[%s5154_s9] sm:$0xff]  }
0x1a00   : > { %v4158_v11 = vpop.f32.mrf.mxu1 }
0x1a01   : > { %v3044_v12 = vadd.f32 %v4966_v23, %v3043_v10  ;;  %v4153_v23 = vpop.f32.mrf.mxu0  ;;  %v3685_v10 = vld [vmem:[%s5153_s8] ss:$0 sm:$0xff] }
0x1a02   : > { %v3040_v13 = vpop.f32.mrf.mxu1 }
0x1a03   : > { %v3045_v14 = vsel %vm735_vm3, %v3044_v12, -inf }
0x1a04   : > { %3046 = vmax.xlane.f32.xlu0 %v3045_v14  ;;  %v4159_v15 = vpop.f32.mrf.mxu1 }
0x1a8d   : > { %v3047_v16 = vpop.xlane.xlu0 %3046 }
0x1a8e   : > { %v3048_v17 = vsub.f32 %v3044_v12, %v3047_v16 }
0x1a90   : > { %v3049_v18 = vmul.f32 1.442695, %v3048_v17 }
0x1a92   : > { %4327 = vpow2.f32 %v3049_v18 }
0x1a9f   : > { %v4328_v19 = vpop.eup %4327 }
0x1aa0   : > { %v3051_v5 = vsel %vm735_vm3, %v4328_v19, 0.0 }
0x1aa1   : > { %3052 = vadd.xlane.f32.xlu1 %v3051_v5 }
0x1b2a   : > { %v3053_v28 = vpop.xlane.xlu1 %3052 }
0x1b2b   : > { %4329 = vrcp.f32 %v3053_v28 }
0x1b38   : > { %v4330_v30 = vpop.eup %4329 }
0x1b39   : > { %v3055_v31 = vmul.f32 %v4330_v30, %v4328_v19 }
0x1b3b   : > { %v3056_v32 = vpack.c.bf16 %v3055_v31, %v3055_v31 }
0x1b3d   : > { %4163 = vmatmul.mubr.msk.bf16.vlgmr.msra.gmra.mxu0 %vm735_vm3, %v3056_v32 }
0x1b3e   : > { %4176 = vmatprep.mubr.msk.bf16.mxu0 %vm4400_vm0, %v4399_v1  ;;  %4173 = vmatpush3.bf16.msra.mxu0 %v4289_v52 }
0x1b3f   : > { %4174 = vmatprep.subr.bf16.mxu0 %v4399_v1 }
0x1b42   : > { %4175 = vmatpush3.bf16.msra.mxu0 %v4290_v53 }
0x1bfd   : > { %v3097_v33 = vpop.f32.mrf.mxu0 }
0x1bfe   : > { %v3103_v34 = vpack.c.bf16 %v3097_v33, %v3097_v33 }
0x1bff   : > { %v4164_v35 = vpop.f32.mrf.mxu0 }
0x1c00   : > { %4169 = vmatmul.mubr.msk.bf16.vlgmr.msra.gmra.mxu1 %vm686_vm2, %v3103_v34  ;;  %v3698_v34 = vld [vmem:[%s5158_s13] ss:$0 sm:$0xff] }
0x1c01   : > { %v3100_v36 = vpop.f32.mrf.mxu0  ;;  %4196 = vmatprep.mubr.msk.bf16.mxu1 %vm4400_vm0, %v4399_v1  ;;  %4181 = vmatpush3.bf16.msra.mxu1 %v4291_v54 }
0x1c02   : > { %4182 = vmatprep.subr.bf16.mxu1 %v4399_v1  ;;  %v3699_v36 = vld [vmem:[%s5159_s14] ss:$0 sm:$0xff] }
0x1c03   : > { %v4165_v37 = vpop.f32.mrf.mxu0 }
0x1c05   : > { %4183 = vmatpush3.bf16.msra.mxu1 %v4292_v55 }
0x1c06   : > { %4184 = vmatprep.subr.bf16.mxu1 %v4399_v1 }
0x1c09   : > { %4185 = vmatpush3.bf16.msra.mxu1 %v4293_v56 }
0x1c0a   : > { %4186 = vmatprep.subr.bf16.mxu1 %v4399_v1 }
0x1c0d   : > { %4187 = vmatpush3.bf16.msra.mxu1 %v4294_v57 }
0x1c0e   : > { %4188 = vmatprep.subr.bf16.mxu1 %v4399_v1 }
0x1cc0   : > { %v3146_v40 = vpop.f32.mrf.mxu1 }
0x1cc1   : > { %v3152_v38 = vadd.f32 %v3146_v40, %v5009_v58  ;;  %v4295_v58 = vld [vmem:[%s5154_s9 + $0x18] sm:$0xff]  }
0x1cc2   : > { %v4170_v41 = vpop.f32.mrf.mxu1  ;;  %4189 = vmatpush3.bf16.msra.mxu1 %v4295_v58 }
0x1cc3   : > { %v3153_v44 = vadd.f32 %v4336_v43, %v3152_v38  ;;  %4190 = vmatprep.subr.bf16.mxu1 %v4399_v1 }
0x1cc4   : > { %v3149_v45 = vpop.f32.mrf.mxu1 }
0x1cc5   : > { %v3161_v46 = vadd.f32 %v3682_v42, %v3153_v44 }
0x1cc6   : > { %v4171_v47 = vpop.f32.mrf.mxu1  ;;  %4191 = vmatpush3.bf16.msra.mxu1 %v4296_v59 }
0x1cc7   : > { %v3162_v48 = vsel %vm527_vm1, %v3161_v46, 0.0  ;;  %4192 = vmatprep.subr.bf16.mxu1 %v4399_v1 }
0x1cc8   : > { %3163 = vadd.xlane.f32.xlu0 %v3162_v48 }
0x1cca   : > { %4193 = vmatpush3.bf16.msra.mxu1 %v4297_v8 }
0x1ccb   : > { %4194 = vmatprep.subr.bf16.mxu1 %v4399_v1  ;;  %v3689_v1 = vld [vmem:[%s5155_s10] ss:$0 sm:$0xff] }
0x1cce   : > { %4195 = vmatpush3.bf16.msra.mxu1 %v4298_v9 }
0x1d51   : > { %v3164_v21 = vpop.xlane.xlu0 %3163 }
0x1d52   : > { %v3166_v50 = vmul.f32 0.03125, %v3164_v21 }
0x1d54   : > { %v3167_v39 = vsub.f32 %v3161_v46, %v3166_v50 }
0x1d56   : > { %v3168_v49 = vmul.f32 %v3167_v39, %v3167_v39 }
0x1d58   : > { %v3169_v51 = vsel %vm527_vm1, %v3168_v49, 0.0 }
0x1d59   : > { %3170 = vadd.xlane.f32.xlu1 %v3169_v51 }
0x1de2   : > { %v3171_v60 = vpop.xlane.xlu1 %3170 }
0x1de3   : > { %v3172_v61 = vmul.f32 0.03125, %v3171_v60 }
0x1de5   : > { %v3173_v62 = vadd.f32 1e-05, %v3172_v61 }
0x1de7   : > { %4331 = vrsqrt.f32 %v3173_v62 }
0x1df4   : > { %v4332_v63 = vpop.eup %4331 }
0x1df5   : > { %v3175_v2 = vmul.f32 %v4332_v63, %v3167_v39 }
0x1df7   : > { %v3183_v4 = vmul.f32 %v3683_v0, %v3175_v2 }
0x1df9   : > { %v3191_v7 = vadd.f32 %v3684_v3, %v3183_v4 }
0x1dfb   : > { %v3192_v6 = vpack.c.bf16 %v3191_v7, %v3191_v7 }
0x1dfd   : > { %4177 = vmatmul.mubr.msk.bf16.vlgmr.msra.gmra.mxu0 %vm527_vm1, %v3192_v6 }
0x1ebd   : > { %v3253_v11 = vpop.f32.mrf.mxu0 }
0x1ebe   : > { %v3254_v12 = vadd.f32 %v3685_v10, %v3253_v11 }
0x1ebf   : > { %v4178_v13 = vpop.f32.mrf.mxu0 }
0x1ec0   : > { %v3259_v14 = vmax.f32 %v3254_v12, 0.0 }
0x1ec1   : > { %v3256_v15 = vpop.f32.mrf.mxu0 }
0x1ec2   : > { %v3260_v16 = vpack.c.bf16 %v3259_v14, %v3259_v14 }
0x1ec3   : > { %v4179_v17 = vpop.f32.mrf.mxu0 }
0x1ec4   : > { %4197 = vmatmul.mubr.bf16.vlgmr.msra.gmra.mxu1 %v3260_v16 }
0x1f84   : > { %v3366_v18 = vpop.f32.mrf.mxu1 }
0x1f85   : > { %v3367_v19 = vadd.f32 %v3689_v1, %v3366_v18 }
0x1f86   : > { %v4198_v5 = vpop.f32.mrf.mxu1 }
0x1f87   : > { %v3372_v20 = vadd.f32 %v3367_v19, %v3191_v7 }
0x1f88   : > { %v3369_v22 = vpop.f32.mrf.mxu1 }
0x1f89   : > { %v3373_v24 = vsel %vm527_vm1, %v3372_v20, 0.0 }
0x1f8a   : > { %3374 = vadd.xlane.f32.xlu0 %v3373_v24  ;;  %v4199_v25 = vpop.f32.mrf.mxu1 }
0x2013   : > { %v3375_v26 = vpop.xlane.xlu0 %3374 }
0x2014   : > { %v3376_v23 = vmul.f32 0.03125, %v3375_v26 }
0x2016   : > { %v3377_v27 = vsub.f32 %v3372_v20, %v3376_v23 }
0x2018   : > { %v3378_v29 = vmul.f32 %v3377_v27, %v3377_v27 }
0x201a   : > { %v3379_v28 = vsel %vm527_vm1, %v3378_v29, 0.0 }
0x201b   : > { %3380 = vadd.xlane.f32.xlu1 %v3379_v28 }
0x20a4   : > { %v3381_v30 = vpop.xlane.xlu1 %3380 }
0x20a5   : > { %v3382_v31 = vmul.f32 0.03125, %v3381_v30 }
0x20a7   : > { %v3383_v32 = vadd.f32 1e-05, %v3382_v31 }
0x20a9   : > { %4333 = vrsqrt.f32 %v3383_v32 }
0x20b6   : > { %v4334_v33 = vpop.eup %4333 }
0x20b7   : > { %v3385_v35 = vmul.f32 %v4334_v33, %v3377_v27 }
0x20b9   : > { %v3393_v37 = vmul.f32 %v3698_v34, %v3385_v35 }
0x20bb   : > { %v3401_v40 = vadd.f32 %v3699_v36, %v3393_v37 }
0x20bd   : > { %3402 = vst.msk [vmem:[%s498_s25] sm:$0xff] %vm527_vm1, %v3401_v40 }
0x20be   : > { %4350 = shalt.err (!%p4347_p3)
}
0x20bf   : > { %s4351_s0 = scalar_lea.hbm %s3415_s2, 128  ;;  %s4355_s27 = scalar_lea.hbm %s5160_s15, 256 }
0x20c0   : > { %p4352_p4 = scmp.ne.s32.totalorder %s3415_s2, %s4351_s0  ;;  %p4356_p9 = scmp.lt.s32.totalorder %s3415_s2, %s5160_s15 }
0x20c1   : > { %p4357_p10 = scmp.lt.s32.totalorder %s4355_s27, %s4351_s0 }
0x20c2   : > { %p4353_p7 = pnand %p4352_p4, %p4520_p5 }
0x20c3   : > { %p4358_p11 = por %p4357_p10, %p4356_p9 }
0x20c4   : > { %p4354_p8 = pneg %p4353_p7 }
0x20c6   : > { %p4359_p12 = pnand %p4358_p11, %p4354_p8 }
0x20c8   : > { %4362 = shalt.err (!%p4359_p12)
}
0x20c9   : > { %4200 = dma.vmem_to_hbm [thread:$0]  (%p4520_p5), %s3418_s26, 128, %s3415_s2, %s3404_s3  }
0x20ca PF: > { %p4206_p13 = scmp.ge.s32.totalorder %s4397_s21, 2  ;;  %s3429_s25 = sand.u32 1, %s4385_s18  }
0x20cb   : > { %s3430_s30 = scalar_lea.sflag [#allocation3], %s3429_s25 }
0x20cc   : > { %p4203_p0 = pnand %p4206_p13, %p4524_p6 }
0x20ce   : > { %p4204_p1 = pneg %p4203_p0 }
0x20d0   : > { %4380 = dma.done.wait (%p4204_p1), %s3430_s30, 128  }
0x20d1   : > { %4382 = vsyncadd (%p4204_p1), %s3430_s30, 4294967168  ;;  %s5177_s21 = sld [smem:[#allocation6_spill]]  ;;  %s5180_s18 = smov %s4389_s19 }
0x20d2   : > { %s5178_s16 = sld [smem:[#allocation5_spill]] }
0x20d3   : > { %s5179_s20 = sld [smem:[#allocation7_spill]] }
0x20d7   : > { %p25_p2 = scmp.ge.s32.totalorder %s5177_s21, 4  }
0x20d8   : > { %s5181_s19 = smov %s5178_s16 }
0x20d9   :  { %27 = sbr.rel (!%p25_p2) target bundleno = 8 (0x8), region = 146 }
0x20de   :  { %3435 = vsyncpa [#allocation3], 1 }
0x20df   :  { %3437 = vsyncpa [#allocation3 + $0x1], 1 }

</bundles_post_ra>
